<compile_context>
chip_gen: v6e
topology: v6e:2x2x1
jax: 0.10.0
libtpu: 0.0.40
codegen_flags: <defaults>
</compile_context>

<pallas_src>
import jax
import jax.numpy as jnp
from jax.experimental import pallas as pl
from jax.experimental.pallas import tpu as pltpu


# ------------------------------- fused kernel ------------------------------- #

def _encoder_kernel(
    # constants (fetched once; block index never changes)
    node_in, edge_in, src_col, dst_col, dst_row, expand,
    # per-layer streamed slabs (double-buffered by the BlockSpec pipeline)
    w_proj_n, w_att_e, w_ffn1_n, w_ffn2_n, w_mix_e, w_ffn1_e,
    v_dn, v_de, v_dnf, v_def,
    # resident outputs
    node_out, edge_out,
    # layer-invariant VMEM scratch (built at layer 0)
    src_m_sc, dst_m_sc, sum_m_sc, dst_mT_sc, inv_deg_sc, eye_e_sc):

    f32 = jnp.float32
    bf16 = jnp.bfloat16
    n_nodes, d_node = node_out.shape
    n_edges, d_edge = edge_out.shape
    n_heads = expand.shape[0]
    d_effn = w_ffn1_e.shape[1]

    def dot(a, b):                       # f32 matmul (exact one-hot gathers / scatters)
        return jnp.dot(a, b, preferred_element_type=f32)

    def bdot(a, w16):                    # bf16 MXU matmul, f32 accumulation
        return jnp.dot(a.astype(bf16), w16, preferred_element_type=f32)

    # ---- layer 0: seed resident state + build layer-invariant masks in scratch ----
    @pl.when(pl.program_id(0) == 0)
    def _():
        node_out[...] = node_in[...]
        edge_out[...] = edge_in[...]
        node_ids = jax.lax.broadcasted_iota(jnp.int32, (n_edges, n_nodes), 1)
        s_m = jnp.where(src_col[...] == node_ids, 1.0, 0.0)      # [E, N] one_hot(src)
        d_m = jnp.where(dst_col[...] == node_ids, 1.0, 0.0)      # [E, N] one_hot(dst)
        src_m_sc[...] = s_m
        dst_m_sc[...] = d_m
        sum_m_sc[...] = s_m + d_m                                 # for n2e edge gather
        d_mT = jnp.where(
            dst_row[...] == jax.lax.broadcasted_iota(jnp.int32, (n_nodes, n_edges), 0),
            1.0, 0.0)                                             # [N, E] one_hot(dst)^T
        dst_mT_sc[...] = d_mT
        deg = dot(d_mT, jnp.ones((n_edges, 1), f32))              # in-degree via MXU
        inv_deg_sc[...] = 1.0 / jnp.maximum(deg, 1.0)             # divide once, not per layer
        eye_e_sc[...] = jnp.where(
            jax.lax.broadcasted_iota(jnp.int32, (n_edges, n_edges), 0)
            == jax.lax.broadcasted_iota(jnp.int32, (n_edges, n_edges), 1),
            1.0, 0.0)                                             # [E, E] column->row helper

    node_vec = node_out[...]                                      # resident node state
    edge_vec = edge_out[...]                                      # resident edge state
    src_m = src_m_sc[...]
    dst_m = dst_m_sc[...]
    dst_mT = dst_mT_sc[...]

    # ---- GATConv: add_self_loops(fill_value='mean') ----
    loop_attr = dot(dst_mT, edge_vec) * inv_deg_sc[...]           # [N, De] scatter-mean

    # ---- fused projection + attention logits (lin_src | lin_src@att_src | lin_src@att_dst)
    pa = bdot(node_vec, w_proj_n[...])                            # [N, Dn+2H]
    x_proj = pa[:, :d_node]                                       # [N, Dn]
    a_src_n = pa[:, d_node:d_node + n_heads]                      # [N, H]
    a_dst_n = pa[:, d_node + n_heads:]                            # [N, H]
    a_edge_e = bdot(edge_vec, w_att_e[...])                       # [E, H]  (lin_edge@att_edge)
    a_edge_l = bdot(loop_attr, w_att_e[...])                      # [N, H]  self-loop logits

    def leaky_relu(a):
        return jnp.where(a > 0, a, 0.2 * a)

    alpha_e = leaky_relu(dot(src_m, a_src_n) + dot(dst_m, a_dst_n) + a_edge_e)  # [E, H]
    alpha_l = leaky_relu(a_src_n + a_dst_n + a_edge_l)                          # [N, H]

    # ---- segment softmax over destinations with EXACT per-segment max (PyG parity) ----
    neg = jnp.float32(-1e30)
    eye_e = eye_e_sc[...]
    head_iota = jax.lax.broadcasted_iota(jnp.int32, (1, n_heads), 1)
    seg_max = None
    for h in range(n_heads):
        # column h of alpha_e re-laid-out as a [1, E] row (no cross-lane transpose op)
        row = jnp.sum(alpha_e[:, h:h + 1] * eye_e, axis=0, keepdims=True)     # [1, E]
        col = jnp.max(jnp.where(dst_mT > 0.0, row, neg), axis=1, keepdims=True)  # [N, 1]
        contrib = jnp.where(head_iota == h, col, 0.0)                          # [N, H]
        seg_max = contrib if seg_max is None else seg_max + contrib
    shift = jnp.maximum(seg_max, alpha_l)                         # self loop is in the segment

    ea_e = jnp.exp(alpha_e - dot(dst_m, shift))                   # [E, H], <= 1
    ea_l = jnp.exp(alpha_l - shift)                               # [N, H], <= 1
    denom = dot(dst_mT, ea_e) + ea_l                              # [N, H], >= 1 by construction
    inv_denom = pl.reciprocal(denom, approx=True)                 # EUP slot, ~free

    # head -> feature broadcast via constant 0/1 expansion matrix (single MXU op each)
    exp_m = expand[...]                                           # [H, Dn]

    def head_expand(w):                                           # [rows, H] -> [rows, Dn]
        return dot(w, exp_m)

    x_src = dot(src_m, x_proj)                                    # [E, Dn] gathered sources
    # Normalize at the node level: factor 1/denom out of the segment sum (removes the
    # per-edge inv_denom gather matmul entirely).
    node_update = ((dot(dst_mT, x_src * head_expand(ea_e))        # aggregated edge messages
                    + x_proj * head_expand(ea_l))                 # self-loop message
                   * head_expand(inv_denom)
                   + v_dn[0:1, :])                                # GAT bias

    # ---- edge update: n2e_lin(node_update)[edge_idx].sum(dim=0) ----
    eu_n = bdot(node_update, w_mix_e[0:d_node, :]) + v_de[0:1, :]   # [N, De]
    edge_update = dot(sum_m_sc[...], eu_n)                          # [E, De]
    edge_x = edge_vec + edge_update

    # ---- PostAttnLayer (LayerNorm -> FFN -> LayerNorm) for nodes and edges ----
    def layer_norm(x, g, b):
        mu = jnp.mean(x, axis=-1, keepdims=True)
        var = jnp.mean((x - mu) ** 2, axis=-1, keepdims=True)
        return (x - mu) * jax.lax.rsqrt(var + 1e-5) * g + b

    # node branch
    h0 = layer_norm(node_vec + node_update, v_dn[1:2, :], v_dn[2:3, :])
    fn = jnp.maximum(bdot(h0, w_ffn1_n[...]) + v_dnf[...], 0.0)
    fn = bdot(fn, w_ffn2_n[...]) + v_dn[3:4, :]
    node_out[...] = layer_norm(h0 + fn, v_dn[4:5, :], v_dn[5:6, :])

    # edge branch
    g0 = layer_norm(edge_x + edge_update, v_de[1:2, :], v_de[2:3, :])
    fe = jnp.maximum(bdot(g0, w_ffn1_e[...]) + v_def[...], 0.0)
    fe = bdot(fe, w_mix_e[d_node:d_node + d_effn, :]) + v_de[3:4, :]
    edge_out[...] = layer_norm(g0 + fe, v_de[4:5, :], v_de[5:6, :])


# ------------------------------ wrapper / glue ------------------------------ #

@jax.jit
def graph_attn_encoder(node_vec, edge_idx, edge_vec, expand, streamed):
    """All num_layers layers in a single fused pallas_call (grid = layers)."""
    n_nodes, d_node = node_vec.shape
    n_edges, d_edge = edge_vec.shape
    num_layers = streamed[0].shape[0]
    n_heads = expand.shape[0]
    f32 = jnp.float32

    src_col = edge_idx[0].astype(jnp.int32).reshape(n_edges, 1)
    dst_col = edge_idx[1].astype(jnp.int32).reshape(n_edges, 1)
    dst_row = edge_idx[1].astype(jnp.int32).reshape(1, n_edges)

    def whole(shape):            # constant block index -> fetched once, kept resident
        return pl.BlockSpec(shape, lambda l: (0, 0))

    def per_layer(p):            # layer l's slice of a stacked [L, a, b] parameter slab
        return pl.BlockSpec((None,) + p.shape[1:], lambda l: (l, 0, 0))

    grid_spec = pltpu.PrefetchScalarGridSpec(
        num_scalar_prefetch=0,
        grid=(num_layers,),
        in_specs=[whole((n_nodes, d_node)), whole((n_edges, d_edge)),
                  whole((n_edges, 1)), whole((n_edges, 1)), whole((1, n_edges)),
                  whole((n_heads, d_node))]
                 + [per_layer(p) for p in streamed],
        out_specs=(pl.BlockSpec((n_nodes, d_node), lambda l: (0, 0)),
                   pl.BlockSpec((n_edges, d_edge), lambda l: (0, 0))),
        scratch_shapes=[
            pltpu.VMEM((n_edges, n_nodes), f32),   # src one-hot
            pltpu.VMEM((n_edges, n_nodes), f32),   # dst one-hot
            pltpu.VMEM((n_edges, n_nodes), f32),   # src + dst (n2e gather)
            pltpu.VMEM((n_nodes, n_edges), f32),   # dst one-hot transposed
            pltpu.VMEM((n_nodes, 1), f32),         # 1 / in-degree
            pltpu.VMEM((n_edges, n_edges), f32),   # eye(E) column->row helper
        ],
    )

    return pl.pallas_call(
        _encoder_kernel,
        out_shape=(jax.ShapeDtypeStruct((n_nodes, d_node), f32),
                   jax.ShapeDtypeStruct((n_edges, d_edge), f32)),
        grid_spec=grid_spec,
        # Residual node/edge streams reuse their input HBM buffers.
        input_output_aliases={0: 0, 1: 1},
        compiler_params=pltpu.CompilerParams(
            dimension_semantics=("arbitrary",),    # layers are strictly sequential
            vmem_limit_bytes=48 * 1024 * 1024),    # explicit budget w/ v7x (64 MiB) headroom
    )(node_vec, edge_vec, src_col, dst_col, dst_row, expand, *streamed)


def init_packed_params(key, num_layers, d_node, d_edge, n_heads, ffn_ratio):
    """Per-layer parameters, pre-folded and packed into a few stacked slabs."""
    d_head = d_node // n_heads
    d_nffn = int(d_node * ffn_ratio)
    d_effn = int(d_edge * ffn_ratio)
    L = num_layers
    s = 0.1
    f32, bf16 = jnp.float32, jnp.bfloat16
    ks = jax.random.split(key, 10)

    def normal(k, *shape):
        return jax.random.normal(k, shape, f32) * s

    def att_matrix(k):
        # PyG stores att_* as [H, C]; fold into a [Dn, H] block-diagonal matrix so that
        # (x.view(N, H, C) * att).sum(-1) == x @ att_matrix.
        att = normal(k, L, n_heads, d_head)
        eye = jnp.eye(n_heads, dtype=f32)
        return (eye[None, :, None, :] * att[:, :, :, None]).reshape(L, d_node, n_heads)

    w_src = normal(ks[0], L, d_node, d_node)                      # lin_src (no bias)
    w_edge = normal(ks[1], L, d_edge, d_node)                     # lin_edge (no bias)
    att_src, att_dst, att_edge = (att_matrix(ks[i]) for i in (2, 3, 4))
    gat_bias = jnp.zeros((L, 1, d_node), f32)
    w_n2e = normal(ks[5], L, d_node, d_edge)
    b_n2e = jnp.zeros((L, 1, d_edge), f32)
    n_w1 = normal(ks[6], L, d_node, d_nffn); n_b1 = jnp.zeros((L, 1, d_nffn), f32)
    n_w2 = normal(ks[7], L, d_nffn, d_node); n_b2 = jnp.zeros((L, 1, d_node), f32)
    e_w1 = normal(ks[8], L, d_edge, d_effn); e_b1 = jnp.zeros((L, 1, d_effn), f32)
    e_w2 = normal(ks[9], L, d_effn, d_edge); e_b2 = jnp.zeros((L, 1, d_edge), f32)
    ones_dn = jnp.ones((L, 1, d_node), f32); zeros_dn = jnp.zeros((L, 1, d_node), f32)
    ones_de = jnp.ones((L, 1, d_edge), f32); zeros_de = jnp.zeros((L, 1, d_edge), f32)

    # Fold att_* through the projections (matmul associativity): a_src = x @ (W_src @ A_src).
    a_src_c = jnp.einsum("lij,ljh->lih", w_src, att_src)          # [L, Dn, H]
    a_dst_c = jnp.einsum("lij,ljh->lih", w_src, att_dst)          # [L, Dn, H]
    w_att_e = jnp.einsum("lij,ljh->lih", w_edge, att_edge)        # [L, De, H]

    # bf16 weight slabs (f32 accumulation in-kernel) + f32 vector slabs.
    w_proj_n = jnp.concatenate([w_src, a_src_c, a_dst_c], axis=2).astype(bf16)  # [L,Dn,Dn+2H]
    w_mix_e = jnp.concatenate([w_n2e, e_w2], axis=1).astype(bf16)               # [L,Dn+Def,De]
    v_dn = jnp.concatenate([gat_bias, ones_dn, zeros_dn, n_b2, ones_dn, zeros_dn], axis=1)
    v_de = jnp.concatenate([b_n2e, ones_de, zeros_de, e_b2, ones_de, zeros_de], axis=1)

    # Constant head -> feature 0/1 expansion matrix (shared by all layers).
    head_ids = jnp.arange(n_heads)[:, None]
    feat_ids = jnp.arange(d_node)[None, :]
    expand = ((feat_ids // d_head) == head_ids).astype(f32)       # [H, Dn]

    streamed = [w_proj_n, w_att_e.astype(bf16),
                n_w1.astype(bf16), n_w2.astype(bf16),
                w_mix_e, e_w1.astype(bf16),
                v_dn, v_de, n_b1, e_b1]
    return expand, streamed


if __name__ == "__main__":
    NODE_EMB, EDGE_EMB = 32, 16
    N_HEADS, NUM_LAYERS, FFN_RATIO = 4, 5, 4.0
    N_NODES, N_EDGES = 8, 12

    key = jax.random.PRNGKey(0)
    k_src, k_off, k_node, k_edge, k_param = jax.random.split(key, 5)

    src = jax.random.randint(k_src, (N_EDGES,), 0, N_NODES, dtype=jnp.int32)
    off = jax.random.randint(k_off, (N_EDGES,), 1, N_NODES, dtype=jnp.int32)
    dst = (src + off) % N_NODES                                   # guarantees no self loops
    edge_idx = jnp.stack([src, dst]).astype(jnp.int32)            # [2, E]
    node_vec = jax.random.normal(k_node, (N_NODES, NODE_EMB), jnp.float32)
    edge_vec = jax.random.normal(k_edge, (N_EDGES, EDGE_EMB), jnp.float32)

    expand, streamed = init_packed_params(k_param, NUM_LAYERS, NODE_EMB, EDGE_EMB,
                                          N_HEADS, FFN_RATIO)

    node_out, edge_out = graph_attn_encoder(node_vec, edge_idx, edge_vec, expand, streamed)
    node_out = jax.block_until_ready(node_out)
    edge_out = jax.block_until_ready(edge_out)

    assert node_out.shape == (N_NODES, NODE_EMB)
    assert edge_out.shape == (N_EDGES, EDGE_EMB)
    assert bool(jnp.all(jnp.isfinite(node_out)))
    assert bool(jnp.all(jnp.isfinite(edge_out)))
    print("KERNEL_OK")
</pallas_src>

<mosaic_0001>
module attributes {stable_mosaic.version = 11 : i64} {
  func.func @_encoder_kernel(%arg0: i32, %arg1: memref<8x32xf32, #tpu.memory_space<vmem>>, %arg2: memref<12x16xf32, #tpu.memory_space<vmem>>, %arg3: memref<12x1xi32, #tpu.memory_space<vmem>>, %arg4: memref<12x1xi32, #tpu.memory_space<vmem>>, %arg5: memref<1x12xi32, #tpu.memory_space<vmem>>, %arg6: memref<4x32xf32, #tpu.memory_space<vmem>>, %arg7: memref<1x32x40xbf16, #tpu.memory_space<vmem>>, %arg8: memref<1x16x4xbf16, #tpu.memory_space<vmem>>, %arg9: memref<1x32x128xbf16, #tpu.memory_space<vmem>>, %arg10: memref<1x128x32xbf16, #tpu.memory_space<vmem>>, %arg11: memref<1x96x16xbf16, #tpu.memory_space<vmem>>, %arg12: memref<1x16x64xbf16, #tpu.memory_space<vmem>>, %arg13: memref<1x6x32xf32, #tpu.memory_space<vmem>>, %arg14: memref<1x6x16xf32, #tpu.memory_space<vmem>>, %arg15: memref<1x1x128xf32, #tpu.memory_space<vmem>>, %arg16: memref<1x1x64xf32, #tpu.memory_space<vmem>>, %arg17: memref<8x32xf32, #tpu.memory_space<vmem>>, %arg18: memref<12x16xf32, #tpu.memory_space<vmem>>, %arg19: memref<12x8xf32, #tpu.memory_space<vmem>>, %arg20: memref<12x8xf32, #tpu.memory_space<vmem>>, %arg21: memref<12x8xf32, #tpu.memory_space<vmem>>, %arg22: memref<8x12xf32, #tpu.memory_space<vmem>>, %arg23: memref<8x1xf32, #tpu.memory_space<vmem>>, %arg24: memref<12x12xf32, #tpu.memory_space<vmem>>) attributes {dimension_semantics = [#tpu.dimension_semantics<arbitrary>], iteration_bounds = array<i64: 5>, scalar_prefetch = 0 : i64, scratch_operands = 6 : i64, tpu.core_type = #tpu.core_type<tc>, window_params = [{pipeline_mode = #tpu.pipeline_mode<synchronous>, transform_indices = @transform_0, window_bounds = array<i64: 8, 32>}, {pipeline_mode = #tpu.pipeline_mode<synchronous>, transform_indices = @transform_1, window_bounds = array<i64: 12, 16>}, {pipeline_mode = #tpu.pipeline_mode<synchronous>, transform_indices = @transform_2, window_bounds = array<i64: 12, 1>}, {pipeline_mode = #tpu.pipeline_mode<synchronous>, transform_indices = @transform_3, window_bounds = array<i64: 12, 1>}, {pipeline_mode = #tpu.pipeline_mode<synchronous>, transform_indices = @transform_4, window_bounds = array<i64: 1, 12>}, {pipeline_mode = #tpu.pipeline_mode<synchronous>, transform_indices = @transform_5, window_bounds = array<i64: 4, 32>}, {transform_indices = @transform_6, window_bounds = array<i64: 1, 32, 40>}, {transform_indices = @transform_7, window_bounds = array<i64: 1, 16, 4>}, {transform_indices = @transform_8, window_bounds = array<i64: 1, 32, 128>}, {transform_indices = @transform_9, window_bounds = array<i64: 1, 128, 32>}, {transform_indices = @transform_10, window_bounds = array<i64: 1, 96, 16>}, {transform_indices = @transform_11, window_bounds = array<i64: 1, 16, 64>}, {transform_indices = @transform_12, window_bounds = array<i64: 1, 6, 32>}, {transform_indices = @transform_13, window_bounds = array<i64: 1, 6, 16>}, {transform_indices = @transform_14, window_bounds = array<i64: 1, 1, 128>}, {transform_indices = @transform_15, window_bounds = array<i64: 1, 1, 64>}, {pipeline_mode = #tpu.pipeline_mode<synchronous>, transform_indices = @transform_16, window_bounds = array<i64: 8, 32>}, {pipeline_mode = #tpu.pipeline_mode<synchronous>, transform_indices = @transform_17, window_bounds = array<i64: 12, 16>}]} {
    %c0_i32 = arith.constant 0 : i32
    %0 = arith.cmpi eq, %arg0, %c0_i32 : i32
    %1 = arith.extui %0 : i1 to i32
    %c0_i32_0 = arith.constant 0 : i32
    %2 = arith.cmpi ne, %1, %c0_i32_0 : i32
    scf.if %2 {
      %c0_147 = arith.constant 0 : index
      %c0_148 = arith.constant 0 : index
      %312 = vector.load %arg1[%c0_147, %c0_148] : memref<8x32xf32, #tpu.memory_space<vmem>>, vector<8x32xf32>
      %c0_149 = arith.constant 0 : index
      %c0_150 = arith.constant 0 : index
      %313 = vector.load %arg17[%c0_149, %c0_150] : memref<8x32xf32, #tpu.memory_space<vmem>>, vector<8x32xf32>
      tpu.vector_store %arg17[%c0_149, %c0_150], %312 {strides = array<i32>} : memref<8x32xf32, #tpu.memory_space<vmem>>, vector<8x32xf32>,
      %c0_151 = arith.constant 0 : index
      %c0_152 = arith.constant 0 : index
      %314 = vector.load %arg2[%c0_151, %c0_152] : memref<12x16xf32, #tpu.memory_space<vmem>>, vector<12x16xf32>
      %c0_153 = arith.constant 0 : index
      %c0_154 = arith.constant 0 : index
      %315 = vector.load %arg18[%c0_153, %c0_154] : memref<12x16xf32, #tpu.memory_space<vmem>>, vector<12x16xf32>
      tpu.vector_store %arg18[%c0_153, %c0_154], %314 {strides = array<i32>} : memref<12x16xf32, #tpu.memory_space<vmem>>, vector<12x16xf32>,
      %316 = tpu.iota {dimensions = array<i32: 1>} : vector<12x8xi32>
      %c0_155 = arith.constant 0 : index
      %c0_156 = arith.constant 0 : index
      %317 = vector.load %arg3[%c0_155, %c0_156] : memref<12x1xi32, #tpu.memory_space<vmem>>, vector<12x1xi32>
      %318 = vector.broadcast %317 : vector<12x1xi32> to vector<12x8xi32>
      %319 = arith.cmpi eq, %318, %316 : vector<12x8xi32>
      %cst_157 = arith.constant 1.000000e+00 : f32
      %cst_158 = arith.constant 0.000000e+00 : f32
      %320 = vector.broadcast %cst_157 : f32 to vector<12x8xf32>
      %321 = vector.broadcast %cst_158 : f32 to vector<12x8xf32>
      %322 = arith.select %319, %320, %321 : vector<12x8xi1>, vector<12x8xf32>
      %c0_159 = arith.constant 0 : index
      %c0_160 = arith.constant 0 : index
      %323 = vector.load %arg4[%c0_159, %c0_160] : memref<12x1xi32, #tpu.memory_space<vmem>>, vector<12x1xi32>
      %324 = vector.broadcast %323 : vector<12x1xi32> to vector<12x8xi32>
      %325 = arith.cmpi eq, %324, %316 : vector<12x8xi32>
      %cst_161 = arith.constant 1.000000e+00 : f32
      %cst_162 = arith.constant 0.000000e+00 : f32
      %326 = vector.broadcast %cst_161 : f32 to vector<12x8xf32>
      %327 = vector.broadcast %cst_162 : f32 to vector<12x8xf32>
      %328 = arith.select %325, %326, %327 : vector<12x8xi1>, vector<12x8xf32>
      %c0_163 = arith.constant 0 : index
      %c0_164 = arith.constant 0 : index
      %329 = vector.load %arg19[%c0_163, %c0_164] : memref<12x8xf32, #tpu.memory_space<vmem>>, vector<12x8xf32>
      tpu.vector_store %arg19[%c0_163, %c0_164], %322 {strides = array<i32>} : memref<12x8xf32, #tpu.memory_space<vmem>>, vector<12x8xf32>,
      %c0_165 = arith.constant 0 : index
      %c0_166 = arith.constant 0 : index
      %330 = vector.load %arg20[%c0_165, %c0_166] : memref<12x8xf32, #tpu.memory_space<vmem>>, vector<12x8xf32>
      tpu.vector_store %arg20[%c0_165, %c0_166], %328 {strides = array<i32>} : memref<12x8xf32, #tpu.memory_space<vmem>>, vector<12x8xf32>,
      %331 = arith.addf %322, %328 : vector<12x8xf32>
      %c0_167 = arith.constant 0 : index
      %c0_168 = arith.constant 0 : index
      %332 = vector.load %arg21[%c0_167, %c0_168] : memref<12x8xf32, #tpu.memory_space<vmem>>, vector<12x8xf32>
      tpu.vector_store %arg21[%c0_167, %c0_168], %331 {strides = array<i32>} : memref<12x8xf32, #tpu.memory_space<vmem>>, vector<12x8xf32>,
      %c0_169 = arith.constant 0 : index
      %c0_170 = arith.constant 0 : index
      %333 = vector.load %arg5[%c0_169, %c0_170] : memref<1x12xi32, #tpu.memory_space<vmem>>, vector<1x12xi32>
      %334 = tpu.iota {dimensions = array<i32: 0>} : vector<8x12xi32>
      %335 = vector.broadcast %333 : vector<1x12xi32> to vector<8x12xi32>
      %336 = arith.cmpi eq, %335, %334 : vector<8x12xi32>
      %cst_171 = arith.constant 1.000000e+00 : f32
      %cst_172 = arith.constant 0.000000e+00 : f32
      %337 = vector.broadcast %cst_171 : f32 to vector<8x12xf32>
      %338 = vector.broadcast %cst_172 : f32 to vector<8x12xf32>
      %339 = arith.select %336, %337, %338 : vector<8x12xi1>, vector<8x12xf32>
      %c0_173 = arith.constant 0 : index
      %c0_174 = arith.constant 0 : index
      %340 = vector.load %arg22[%c0_173, %c0_174] : memref<8x12xf32, #tpu.memory_space<vmem>>, vector<8x12xf32>
      tpu.vector_store %arg22[%c0_173, %c0_174], %339 {strides = array<i32>} : memref<8x12xf32, #tpu.memory_space<vmem>>, vector<8x12xf32>,
      %cst_175 = arith.constant 1.000000e+00 : f32
      %341 = vector.broadcast %cst_175 : f32 to vector<12x1xf32>
      %cst_176 = arith.constant dense<0.000000e+00> : vector<8x1xf32>
      %342 = tpu.matmul %339, %341, %cst_176 {dimension_numbers = #tpu.dot_dimension_numbers<[1], [0], [0], [1], [0, 0, 1, 1], [], []>} : vector<8x12xf32>, vector<12x1xf32>, vector<8x1xf32> -> vector<8x1xf32>
      %cst_177 = arith.constant 1.000000e+00 : f32
      %343 = vector.broadcast %cst_177 : f32 to vector<8x1xf32>
      %344 = arith.maximumf %342, %343 : vector<8x1xf32>
      %cst_178 = arith.constant 1.000000e+00 : f32
      %345 = vector.broadcast %cst_178 : f32 to vector<8x1xf32>
      %346 = arith.divf %345, %344 : vector<8x1xf32>
      %c0_179 = arith.constant 0 : index
      %c0_180 = arith.constant 0 : index
      %347 = vector.load %arg23[%c0_179, %c0_180] : memref<8x1xf32, #tpu.memory_space<vmem>>, vector<8x1xf32>
      tpu.vector_store %arg23[%c0_179, %c0_180], %346 {strides = array<i32>} : memref<8x1xf32, #tpu.memory_space<vmem>>, vector<8x1xf32>,
      %348 = tpu.iota {dimensions = array<i32: 0>} : vector<12x12xi32>
      %349 = tpu.iota {dimensions = array<i32: 1>} : vector<12x12xi32>
      %350 = arith.cmpi eq, %348, %349 : vector<12x12xi32>
      %cst_181 = arith.constant 1.000000e+00 : f32
      %cst_182 = arith.constant 0.000000e+00 : f32
      %351 = vector.broadcast %cst_181 : f32 to vector<12x12xf32>
      %352 = vector.broadcast %cst_182 : f32 to vector<12x12xf32>
      %353 = arith.select %350, %351, %352 : vector<12x12xi1>, vector<12x12xf32>
      %c0_183 = arith.constant 0 : index
      %c0_184 = arith.constant 0 : index
      %354 = vector.load %arg24[%c0_183, %c0_184] : memref<12x12xf32, #tpu.memory_space<vmem>>, vector<12x12xf32>
      tpu.vector_store %arg24[%c0_183, %c0_184], %353 {strides = array<i32>} : memref<12x12xf32, #tpu.memory_space<vmem>>, vector<12x12xf32>,
    } else {
    }
    %c0 = arith.constant 0 : index
    %c0_1 = arith.constant 0 : index
    %3 = vector.load %arg17[%c0, %c0_1] : memref<8x32xf32, #tpu.memory_space<vmem>>, vector<8x32xf32>
    %c0_2 = arith.constant 0 : index
    %c0_3 = arith.constant 0 : index
    %4 = vector.load %arg18[%c0_2, %c0_3] : memref<12x16xf32, #tpu.memory_space<vmem>>, vector<12x16xf32>
    %c0_4 = arith.constant 0 : index
    %c0_5 = arith.constant 0 : index
    %5 = vector.load %arg19[%c0_4, %c0_5] : memref<12x8xf32, #tpu.memory_space<vmem>>, vector<12x8xf32>
    %c0_6 = arith.constant 0 : index
    %c0_7 = arith.constant 0 : index
    %6 = vector.load %arg20[%c0_6, %c0_7] : memref<12x8xf32, #tpu.memory_space<vmem>>, vector<12x8xf32>
    %c0_8 = arith.constant 0 : index
    %c0_9 = arith.constant 0 : index
    %7 = vector.load %arg22[%c0_8, %c0_9] : memref<8x12xf32, #tpu.memory_space<vmem>>, vector<8x12xf32>
    %cst = arith.constant dense<0.000000e+00> : vector<8x16xf32>
    %8 = tpu.matmul %7, %4, %cst {dimension_numbers = #tpu.dot_dimension_numbers<[1], [0], [0], [1], [0, 0, 1, 1], [], []>} : vector<8x12xf32>, vector<12x16xf32>, vector<8x16xf32> -> vector<8x16xf32>
    %c0_10 = arith.constant 0 : index
    %c0_11 = arith.constant 0 : index
    %9 = vector.load %arg23[%c0_10, %c0_11] : memref<8x1xf32, #tpu.memory_space<vmem>>, vector<8x1xf32>
    %10 = vector.broadcast %9 : vector<8x1xf32> to vector<8x16xf32>
    %11 = arith.mulf %8, %10 : vector<8x16xf32>
    %c0_12 = arith.constant 0 : index
    %c0_13 = arith.constant 0 : index
    %c0_14 = arith.constant 0 : index
    %12 = vector.load %arg7[%c0_12, %c0_13, %c0_14] : memref<1x32x40xbf16, #tpu.memory_space<vmem>>, vector<1x32x40xbf16>
    %13 = vector.shape_cast %12 : vector<1x32x40xbf16> to vector<32x40xbf16>
    %14 = arith.truncf %3 : vector<8x32xf32> to vector<8x32xbf16>
    %cst_15 = arith.constant dense<0.000000e+00> : vector<8x40xf32>
    %15 = tpu.matmul %14, %13, %cst_15 {dimension_numbers = #tpu.dot_dimension_numbers<[1], [0], [0], [1], [0, 0, 1, 1], [], []>} : vector<8x32xbf16>, vector<32x40xbf16>, vector<8x40xf32> -> vector<8x40xf32>
    %16 = vector.extract_strided_slice %15 {offsets = [0, 0], sizes = [8, 32], strides = [1, 1]} : vector<8x40xf32> to vector<8x32xf32>
    %17 = vector.extract_strided_slice %15 {offsets = [0, 32], sizes = [8, 4], strides = [1, 1]} : vector<8x40xf32> to vector<8x4xf32>
    %18 = vector.extract_strided_slice %15 {offsets = [0, 36], sizes = [8, 4], strides = [1, 1]} : vector<8x40xf32> to vector<8x4xf32>
    %c0_16 = arith.constant 0 : index
    %c0_17 = arith.constant 0 : index
    %c0_18 = arith.constant 0 : index
    %19 = vector.load %arg8[%c0_16, %c0_17, %c0_18] : memref<1x16x4xbf16, #tpu.memory_space<vmem>>, vector<1x16x4xbf16>
    %20 = vector.shape_cast %19 : vector<1x16x4xbf16> to vector<16x4xbf16>
    %21 = arith.truncf %4 : vector<12x16xf32> to vector<12x16xbf16>
    %cst_19 = arith.constant dense<0.000000e+00> : vector<12x4xf32>
    %22 = tpu.matmul %21, %20, %cst_19 {dimension_numbers = #tpu.dot_dimension_numbers<[1], [0], [0], [1], [0, 0, 1, 1], [], []>} : vector<12x16xbf16>, vector<16x4xbf16>, vector<12x4xf32> -> vector<12x4xf32>
    %c0_20 = arith.constant 0 : index
    %c0_21 = arith.constant 0 : index
    %c0_22 = arith.constant 0 : index
    %23 = vector.load %arg8[%c0_20, %c0_21, %c0_22] : memref<1x16x4xbf16, #tpu.memory_space<vmem>>, vector<1x16x4xbf16>
    %24 = vector.shape_cast %23 : vector<1x16x4xbf16> to vector<16x4xbf16>
    %25 = arith.truncf %11 : vector<8x16xf32> to vector<8x16xbf16>
    %cst_23 = arith.constant dense<0.000000e+00> : vector<8x4xf32>
    %26 = tpu.matmul %25, %24, %cst_23 {dimension_numbers = #tpu.dot_dimension_numbers<[1], [0], [0], [1], [0, 0, 1, 1], [], []>} : vector<8x16xbf16>, vector<16x4xbf16>, vector<8x4xf32> -> vector<8x4xf32>
    %cst_24 = arith.constant dense<0.000000e+00> : vector<12x4xf32>
    %27 = tpu.matmul %5, %17, %cst_24 {dimension_numbers = #tpu.dot_dimension_numbers<[1], [0], [0], [1], [0, 0, 1, 1], [], []>} : vector<12x8xf32>, vector<8x4xf32>, vector<12x4xf32> -> vector<12x4xf32>
    %cst_25 = arith.constant dense<0.000000e+00> : vector<12x4xf32>
    %28 = tpu.matmul %6, %18, %cst_25 {dimension_numbers = #tpu.dot_dimension_numbers<[1], [0], [0], [1], [0, 0, 1, 1], [], []>} : vector<12x8xf32>, vector<8x4xf32>, vector<12x4xf32> -> vector<12x4xf32>
    %29 = arith.addf %27, %28 : vector<12x4xf32>
    %30 = arith.addf %29, %22 : vector<12x4xf32>
    %cst_26 = arith.constant 0.000000e+00 : f32
    %31 = vector.broadcast %cst_26 : f32 to vector<12x4xf32>
    %32 = arith.cmpf ogt, %30, %31 : vector<12x4xf32>
    %cst_27 = arith.constant 2.000000e-01 : f32
    %33 = vector.broadcast %cst_27 : f32 to vector<12x4xf32>
    %34 = arith.mulf %33, %30 : vector<12x4xf32>
    %35 = arith.select %32, %30, %34 : vector<12x4xi1>, vector<12x4xf32>
    %36 = arith.addf %17, %18 : vector<8x4xf32>
    %37 = arith.addf %36, %26 : vector<8x4xf32>
    %cst_28 = arith.constant 0.000000e+00 : f32
    %38 = vector.broadcast %cst_28 : f32 to vector<8x4xf32>
    %39 = arith.cmpf ogt, %37, %38 : vector<8x4xf32>
    %cst_29 = arith.constant 2.000000e-01 : f32
    %40 = vector.broadcast %cst_29 : f32 to vector<8x4xf32>
    %41 = arith.mulf %40, %37 : vector<8x4xf32>
    %42 = arith.select %39, %37, %41 : vector<8x4xi1>, vector<8x4xf32>
    %c0_30 = arith.constant 0 : index
    %c0_31 = arith.constant 0 : index
    %43 = vector.load %arg24[%c0_30, %c0_31] : memref<12x12xf32, #tpu.memory_space<vmem>>, vector<12x12xf32>
    %44 = tpu.iota {dimensions = array<i32: 1>} : vector<1x4xi32>
    %45 = vector.extract_strided_slice %35 {offsets = [0, 0], sizes = [12, 1], strides = [1, 1]} : vector<12x4xf32> to vector<12x1xf32>
    %46 = vector.broadcast %45 : vector<12x1xf32> to vector<12x12xf32>
    %47 = arith.mulf %46, %43 : vector<12x12xf32>
    %cst_32 = arith.constant dense<0.000000e+00> : vector<12xf32>
    %48 = vector.multi_reduction <add>, %47, %cst_32 [0] : vector<12x12xf32> to vector<12xf32>
    %49 = vector.shape_cast %48 : vector<12xf32> to vector<1x12xf32>
    %cst_33 = arith.constant 0.000000e+00 : f32
    %50 = vector.broadcast %cst_33 : f32 to vector<8x12xf32>
    %51 = arith.cmpf ogt, %7, %50 : vector<8x12xf32>
    %cst_34 = arith.constant -1.000000e+30 : f32
    %52 = vector.shape_cast %49 : vector<1x12xf32> to vector<1x12xf32>
    %53 = vector.broadcast %52 : vector<1x12xf32> to vector<8x12xf32>
    %54 = vector.broadcast %cst_34 : f32 to vector<8x12xf32>
    %55 = arith.select %51, %53, %54 : vector<8x12xi1>, vector<8x12xf32>
    %cst_35 = arith.constant dense<0xFF800000> : vector<8xf32>
    %56 = vector.multi_reduction <maximumf>, %55, %cst_35 [1] : vector<8x12xf32> to vector<8xf32>
    %57 = vector.shape_cast %56 : vector<8xf32> to vector<8x1xf32>
    %c0_i32_36 = arith.constant 0 : i32
    %58 = vector.broadcast %c0_i32_36 : i32 to vector<1x4xi32>
    %59 = arith.cmpi eq, %44, %58 : vector<1x4xi32>
    %cst_37 = arith.constant 0.000000e+00 : f32
    %60 = vector.shape_cast %59 : vector<1x4xi1> to vector<1x4xi1>
    %61 = vector.broadcast %60 : vector<1x4xi1> to vector<8x4xi1>
    %62 = vector.shape_cast %57 : vector<8x1xf32> to vector<8x1xf32>
    %63 = vector.broadcast %62 : vector<8x1xf32> to vector<8x4xf32>
    %64 = vector.broadcast %cst_37 : f32 to vector<8x4xf32>
    %65 = arith.select %61, %63, %64 : vector<8x4xi1>, vector<8x4xf32>
    %66 = vector.extract_strided_slice %35 {offsets = [0, 1], sizes = [12, 1], strides = [1, 1]} : vector<12x4xf32> to vector<12x1xf32>
    %67 = vector.broadcast %66 : vector<12x1xf32> to vector<12x12xf32>
    %68 = arith.mulf %67, %43 : vector<12x12xf32>
    %cst_38 = arith.constant dense<0.000000e+00> : vector<12xf32>
    %69 = vector.multi_reduction <add>, %68, %cst_38 [0] : vector<12x12xf32> to vector<12xf32>
    %70 = vector.shape_cast %69 : vector<12xf32> to vector<1x12xf32>
    %cst_39 = arith.constant 0.000000e+00 : f32
    %71 = vector.broadcast %cst_39 : f32 to vector<8x12xf32>
    %72 = arith.cmpf ogt, %7, %71 : vector<8x12xf32>
    %cst_40 = arith.constant -1.000000e+30 : f32
    %73 = vector.shape_cast %70 : vector<1x12xf32> to vector<1x12xf32>
    %74 = vector.broadcast %73 : vector<1x12xf32> to vector<8x12xf32>
    %75 = vector.broadcast %cst_40 : f32 to vector<8x12xf32>
    %76 = arith.select %72, %74, %75 : vector<8x12xi1>, vector<8x12xf32>
    %cst_41 = arith.constant dense<0xFF800000> : vector<8xf32>
    %77 = vector.multi_reduction <maximumf>, %76, %cst_41 [1] : vector<8x12xf32> to vector<8xf32>
    %78 = vector.shape_cast %77 : vector<8xf32> to vector<8x1xf32>
    %c1_i32 = arith.constant 1 : i32
    %79 = vector.broadcast %c1_i32 : i32 to vector<1x4xi32>
    %80 = arith.cmpi eq, %44, %79 : vector<1x4xi32>
    %cst_42 = arith.constant 0.000000e+00 : f32
    %81 = vector.shape_cast %80 : vector<1x4xi1> to vector<1x4xi1>
    %82 = vector.broadcast %81 : vector<1x4xi1> to vector<8x4xi1>
    %83 = vector.shape_cast %78 : vector<8x1xf32> to vector<8x1xf32>
    %84 = vector.broadcast %83 : vector<8x1xf32> to vector<8x4xf32>
    %85 = vector.broadcast %cst_42 : f32 to vector<8x4xf32>
    %86 = arith.select %82, %84, %85 : vector<8x4xi1>, vector<8x4xf32>
    %87 = arith.addf %65, %86 : vector<8x4xf32>
    %88 = vector.extract_strided_slice %35 {offsets = [0, 2], sizes = [12, 1], strides = [1, 1]} : vector<12x4xf32> to vector<12x1xf32>
    %89 = vector.broadcast %88 : vector<12x1xf32> to vector<12x12xf32>
    %90 = arith.mulf %89, %43 : vector<12x12xf32>
    %cst_43 = arith.constant dense<0.000000e+00> : vector<12xf32>
    %91 = vector.multi_reduction <add>, %90, %cst_43 [0] : vector<12x12xf32> to vector<12xf32>
    %92 = vector.shape_cast %91 : vector<12xf32> to vector<1x12xf32>
    %cst_44 = arith.constant 0.000000e+00 : f32
    %93 = vector.broadcast %cst_44 : f32 to vector<8x12xf32>
    %94 = arith.cmpf ogt, %7, %93 : vector<8x12xf32>
    %cst_45 = arith.constant -1.000000e+30 : f32
    %95 = vector.shape_cast %92 : vector<1x12xf32> to vector<1x12xf32>
    %96 = vector.broadcast %95 : vector<1x12xf32> to vector<8x12xf32>
    %97 = vector.broadcast %cst_45 : f32 to vector<8x12xf32>
    %98 = arith.select %94, %96, %97 : vector<8x12xi1>, vector<8x12xf32>
    %cst_46 = arith.constant dense<0xFF800000> : vector<8xf32>
    %99 = vector.multi_reduction <maximumf>, %98, %cst_46 [1] : vector<8x12xf32> to vector<8xf32>
    %100 = vector.shape_cast %99 : vector<8xf32> to vector<8x1xf32>
    %c2_i32 = arith.constant 2 : i32
    %101 = vector.broadcast %c2_i32 : i32 to vector<1x4xi32>
    %102 = arith.cmpi eq, %44, %101 : vector<1x4xi32>
    %cst_47 = arith.constant 0.000000e+00 : f32
    %103 = vector.shape_cast %102 : vector<1x4xi1> to vector<1x4xi1>
    %104 = vector.broadcast %103 : vector<1x4xi1> to vector<8x4xi1>
    %105 = vector.shape_cast %100 : vector<8x1xf32> to vector<8x1xf32>
    %106 = vector.broadcast %105 : vector<8x1xf32> to vector<8x4xf32>
    %107 = vector.broadcast %cst_47 : f32 to vector<8x4xf32>
    %108 = arith.select %104, %106, %107 : vector<8x4xi1>, vector<8x4xf32>
    %109 = arith.addf %87, %108 : vector<8x4xf32>
    %110 = vector.extract_strided_slice %35 {offsets = [0, 3], sizes = [12, 1], strides = [1, 1]} : vector<12x4xf32> to vector<12x1xf32>
    %111 = vector.broadcast %110 : vector<12x1xf32> to vector<12x12xf32>
    %112 = arith.mulf %111, %43 : vector<12x12xf32>
    %cst_48 = arith.constant dense<0.000000e+00> : vector<12xf32>
    %113 = vector.multi_reduction <add>, %112, %cst_48 [0] : vector<12x12xf32> to vector<12xf32>
    %114 = vector.shape_cast %113 : vector<12xf32> to vector<1x12xf32>
    %cst_49 = arith.constant 0.000000e+00 : f32
    %115 = vector.broadcast %cst_49 : f32 to vector<8x12xf32>
    %116 = arith.cmpf ogt, %7, %115 : vector<8x12xf32>
    %cst_50 = arith.constant -1.000000e+30 : f32
    %117 = vector.shape_cast %114 : vector<1x12xf32> to vector<1x12xf32>
    %118 = vector.broadcast %117 : vector<1x12xf32> to vector<8x12xf32>
    %119 = vector.broadcast %cst_50 : f32 to vector<8x12xf32>
    %120 = arith.select %116, %118, %119 : vector<8x12xi1>, vector<8x12xf32>
    %cst_51 = arith.constant dense<0xFF800000> : vector<8xf32>
    %121 = vector.multi_reduction <maximumf>, %120, %cst_51 [1] : vector<8x12xf32> to vector<8xf32>
    %122 = vector.shape_cast %121 : vector<8xf32> to vector<8x1xf32>
    %c3_i32 = arith.constant 3 : i32
    %123 = vector.broadcast %c3_i32 : i32 to vector<1x4xi32>
    %124 = arith.cmpi eq, %44, %123 : vector<1x4xi32>
    %cst_52 = arith.constant 0.000000e+00 : f32
    %125 = vector.shape_cast %124 : vector<1x4xi1> to vector<1x4xi1>
    %126 = vector.broadcast %125 : vector<1x4xi1> to vector<8x4xi1>
    %127 = vector.shape_cast %122 : vector<8x1xf32> to vector<8x1xf32>
    %128 = vector.broadcast %127 : vector<8x1xf32> to vector<8x4xf32>
    %129 = vector.broadcast %cst_52 : f32 to vector<8x4xf32>
    %130 = arith.select %126, %128, %129 : vector<8x4xi1>, vector<8x4xf32>
    %131 = arith.addf %109, %130 : vector<8x4xf32>
    %132 = arith.maximumf %131, %42 : vector<8x4xf32>
    %cst_53 = arith.constant dense<0.000000e+00> : vector<12x4xf32>
    %133 = tpu.matmul %6, %132, %cst_53 {dimension_numbers = #tpu.dot_dimension_numbers<[1], [0], [0], [1], [0, 0, 1, 1], [], []>} : vector<12x8xf32>, vector<8x4xf32>, vector<12x4xf32> -> vector<12x4xf32>
    %134 = arith.subf %35, %133 : vector<12x4xf32>
    %135 = math.exp %134 : vector<12x4xf32>
    %136 = arith.subf %42, %132 : vector<8x4xf32>
    %137 = math.exp %136 : vector<8x4xf32>
    %cst_54 = arith.constant dense<0.000000e+00> : vector<8x4xf32>
    %138 = tpu.matmul %7, %135, %cst_54 {dimension_numbers = #tpu.dot_dimension_numbers<[1], [0], [0], [1], [0, 0, 1, 1], [], []>} : vector<8x12xf32>, vector<12x4xf32>, vector<8x4xf32> -> vector<8x4xf32>
    %139 = arith.addf %138, %137 : vector<8x4xf32>
    %140 = tpu.reciprocal %139 {approx = true} : vector<8x4xf32> -> vector<8x4xf32>
    %c0_55 = arith.constant 0 : index
    %c0_56 = arith.constant 0 : index
    %141 = vector.load %arg6[%c0_55, %c0_56] : memref<4x32xf32, #tpu.memory_space<vmem>>, vector<4x32xf32>
    %cst_57 = arith.constant dense<0.000000e+00> : vector<12x32xf32>
    %142 = tpu.matmul %5, %16, %cst_57 {dimension_numbers = #tpu.dot_dimension_numbers<[1], [0], [0], [1], [0, 0, 1, 1], [], []>} : vector<12x8xf32>, vector<8x32xf32>, vector<12x32xf32> -> vector<12x32xf32>
    %cst_58 = arith.constant dense<0.000000e+00> : vector<12x32xf32>
    %143 = tpu.matmul %135, %141, %cst_58 {dimension_numbers = #tpu.dot_dimension_numbers<[1], [0], [0], [1], [0, 0, 1, 1], [], []>} : vector<12x4xf32>, vector<4x32xf32>, vector<12x32xf32> -> vector<12x32xf32>
    %144 = arith.mulf %142, %143 : vector<12x32xf32>
    %cst_59 = arith.constant dense<0.000000e+00> : vector<8x32xf32>
    %145 = tpu.matmul %7, %144, %cst_59 {dimension_numbers = #tpu.dot_dimension_numbers<[1], [0], [0], [1], [0, 0, 1, 1], [], []>} : vector<8x12xf32>, vector<12x32xf32>, vector<8x32xf32> -> vector<8x32xf32>
    %cst_60 = arith.constant dense<0.000000e+00> : vector<8x32xf32>
    %146 = tpu.matmul %137, %141, %cst_60 {dimension_numbers = #tpu.dot_dimension_numbers<[1], [0], [0], [1], [0, 0, 1, 1], [], []>} : vector<8x4xf32>, vector<4x32xf32>, vector<8x32xf32> -> vector<8x32xf32>
    %147 = arith.mulf %16, %146 : vector<8x32xf32>
    %148 = arith.addf %145, %147 : vector<8x32xf32>
    %cst_61 = arith.constant dense<0.000000e+00> : vector<8x32xf32>
    %149 = tpu.matmul %140, %141, %cst_61 {dimension_numbers = #tpu.dot_dimension_numbers<[1], [0], [0], [1], [0, 0, 1, 1], [], []>} : vector<8x4xf32>, vector<4x32xf32>, vector<8x32xf32> -> vector<8x32xf32>
    %150 = arith.mulf %148, %149 : vector<8x32xf32>
    %c0_62 = arith.constant 0 : index
    %c0_63 = arith.constant 0 : index
    %c0_64 = arith.constant 0 : index
    %151 = vector.load %arg13[%c0_62, %c0_63, %c0_64] : memref<1x6x32xf32, #tpu.memory_space<vmem>>, vector<1x1x32xf32>
    %152 = vector.shape_cast %151 : vector<1x1x32xf32> to vector<1x32xf32>
    %153 = vector.broadcast %152 : vector<1x32xf32> to vector<8x32xf32>
    %154 = arith.addf %150, %153 : vector<8x32xf32>
    %c0_65 = arith.constant 0 : index
    %c0_66 = arith.constant 0 : index
    %c0_67 = arith.constant 0 : index
    %155 = vector.load %arg11[%c0_65, %c0_66, %c0_67] : memref<1x96x16xbf16, #tpu.memory_space<vmem>>, vector<1x32x16xbf16>
    %156 = vector.shape_cast %155 : vector<1x32x16xbf16> to vector<32x16xbf16>
    %157 = arith.truncf %154 : vector<8x32xf32> to vector<8x32xbf16>
    %cst_68 = arith.constant dense<0.000000e+00> : vector<8x16xf32>
    %158 = tpu.matmul %157, %156, %cst_68 {dimension_numbers = #tpu.dot_dimension_numbers<[1], [0], [0], [1], [0, 0, 1, 1], [], []>} : vector<8x32xbf16>, vector<32x16xbf16>, vector<8x16xf32> -> vector<8x16xf32>
    %c0_69 = arith.constant 0 : index
    %c0_70 = arith.constant 0 : index
    %c0_71 = arith.constant 0 : index
    %159 = vector.load %arg14[%c0_69, %c0_70, %c0_71] : memref<1x6x16xf32, #tpu.memory_space<vmem>>, vector<1x1x16xf32>
    %160 = vector.shape_cast %159 : vector<1x1x16xf32> to vector<1x16xf32>
    %161 = vector.broadcast %160 : vector<1x16xf32> to vector<8x16xf32>
    %162 = arith.addf %158, %161 : vector<8x16xf32>
    %c0_72 = arith.constant 0 : index
    %c0_73 = arith.constant 0 : index
    %163 = vector.load %arg21[%c0_72, %c0_73] : memref<12x8xf32, #tpu.memory_space<vmem>>, vector<12x8xf32>
    %cst_74 = arith.constant dense<0.000000e+00> : vector<12x16xf32>
    %164 = tpu.matmul %163, %162, %cst_74 {dimension_numbers = #tpu.dot_dimension_numbers<[1], [0], [0], [1], [0, 0, 1, 1], [], []>} : vector<12x8xf32>, vector<8x16xf32>, vector<12x16xf32> -> vector<12x16xf32>
    %165 = arith.addf %4, %164 : vector<12x16xf32>
    %166 = arith.addf %3, %154 : vector<8x32xf32>
    %c0_75 = arith.constant 0 : index
    %c1 = arith.constant 1 : index
    %c0_76 = arith.constant 0 : index
    %167 = vector.load %arg13[%c0_75, %c1, %c0_76] : memref<1x6x32xf32, #tpu.memory_space<vmem>>, vector<1x1x32xf32>
    %168 = vector.shape_cast %167 : vector<1x1x32xf32> to vector<1x32xf32>
    %c0_77 = arith.constant 0 : index
    %c2 = arith.constant 2 : index
    %c0_78 = arith.constant 0 : index
    %169 = vector.load %arg13[%c0_77, %c2, %c0_78] : memref<1x6x32xf32, #tpu.memory_space<vmem>>, vector<1x1x32xf32>
    %170 = vector.shape_cast %169 : vector<1x1x32xf32> to vector<1x32xf32>
    %cst_79 = arith.constant dense<0.000000e+00> : vector<8xf32>
    %171 = vector.multi_reduction <add>, %166, %cst_79 [1] : vector<8x32xf32> to vector<8xf32>
    %172 = vector.shape_cast %171 : vector<8xf32> to vector<8x1xf32>
    %cst_80 = arith.constant 3.200000e+01 : f32
    %173 = vector.broadcast %cst_80 : f32 to vector<8x1xf32>
    %174 = arith.divf %172, %173 : vector<8x1xf32>
    %175 = vector.broadcast %174 : vector<8x1xf32> to vector<8x32xf32>
    %176 = arith.subf %166, %175 : vector<8x32xf32>
    %177 = arith.mulf %176, %176 : vector<8x32xf32>
    %cst_81 = arith.constant dense<0.000000e+00> : vector<8xf32>
    %178 = vector.multi_reduction <add>, %177, %cst_81 [1] : vector<8x32xf32> to vector<8xf32>
    %179 = vector.shape_cast %178 : vector<8xf32> to vector<8x1xf32>
    %cst_82 = arith.constant 3.200000e+01 : f32
    %180 = vector.broadcast %cst_82 : f32 to vector<8x1xf32>
    %181 = arith.divf %179, %180 : vector<8x1xf32>
    %182 = vector.broadcast %174 : vector<8x1xf32> to vector<8x32xf32>
    %183 = arith.subf %166, %182 : vector<8x32xf32>
    %cst_83 = arith.constant 9.99999974E-6 : f32
    %184 = vector.broadcast %cst_83 : f32 to vector<8x1xf32>
    %185 = arith.addf %181, %184 : vector<8x1xf32>
    %186 = math.rsqrt %185 : vector<8x1xf32>
    %187 = vector.broadcast %186 : vector<8x1xf32> to vector<8x32xf32>
    %188 = arith.mulf %183, %187 : vector<8x32xf32>
    %189 = vector.broadcast %168 : vector<1x32xf32> to vector<8x32xf32>
    %190 = arith.mulf %188, %189 : vector<8x32xf32>
    %191 = vector.broadcast %170 : vector<1x32xf32> to vector<8x32xf32>
    %192 = arith.addf %190, %191 : vector<8x32xf32>
    %c0_84 = arith.constant 0 : index
    %c0_85 = arith.constant 0 : index
    %c0_86 = arith.constant 0 : index
    %193 = vector.load %arg9[%c0_84, %c0_85, %c0_86] : memref<1x32x128xbf16, #tpu.memory_space<vmem>>, vector<1x32x128xbf16>
    %194 = vector.shape_cast %193 : vector<1x32x128xbf16> to vector<32x128xbf16>
    %195 = arith.truncf %192 : vector<8x32xf32> to vector<8x32xbf16>
    %cst_87 = arith.constant dense<0.000000e+00> : vector<8x128xf32>
    %196 = tpu.matmul %195, %194, %cst_87 {dimension_numbers = #tpu.dot_dimension_numbers<[1], [0], [0], [1], [0, 0, 1, 1], [], []>} : vector<8x32xbf16>, vector<32x128xbf16>, vector<8x128xf32> -> vector<8x128xf32>
    %c0_88 = arith.constant 0 : index
    %c0_89 = arith.constant 0 : index
    %c0_90 = arith.constant 0 : index
    %197 = vector.load %arg15[%c0_88, %c0_89, %c0_90] : memref<1x1x128xf32, #tpu.memory_space<vmem>>, vector<1x1x128xf32>
    %198 = vector.shape_cast %197 : vector<1x1x128xf32> to vector<1x128xf32>
    %199 = vector.broadcast %198 : vector<1x128xf32> to vector<8x128xf32>
    %200 = arith.addf %196, %199 : vector<8x128xf32>
    %cst_91 = arith.constant 0.000000e+00 : f32
    %201 = vector.broadcast %cst_91 : f32 to vector<8x128xf32>
    %202 = arith.maximumf %200, %201 : vector<8x128xf32>
    %c0_92 = arith.constant 0 : index
    %c0_93 = arith.constant 0 : index
    %c0_94 = arith.constant 0 : index
    %203 = vector.load %arg10[%c0_92, %c0_93, %c0_94] : memref<1x128x32xbf16, #tpu.memory_space<vmem>>, vector<1x128x32xbf16>
    %204 = vector.shape_cast %203 : vector<1x128x32xbf16> to vector<128x32xbf16>
    %205 = arith.truncf %202 : vector<8x128xf32> to vector<8x128xbf16>
    %cst_95 = arith.constant dense<0.000000e+00> : vector<8x32xf32>
    %206 = tpu.matmul %205, %204, %cst_95 {dimension_numbers = #tpu.dot_dimension_numbers<[1], [0], [0], [1], [0, 0, 1, 1], [], []>} : vector<8x128xbf16>, vector<128x32xbf16>, vector<8x32xf32> -> vector<8x32xf32>
    %c0_96 = arith.constant 0 : index
    %c3 = arith.constant 3 : index
    %c0_97 = arith.constant 0 : index
    %207 = vector.load %arg13[%c0_96, %c3, %c0_97] : memref<1x6x32xf32, #tpu.memory_space<vmem>>, vector<1x1x32xf32>
    %208 = vector.shape_cast %207 : vector<1x1x32xf32> to vector<1x32xf32>
    %209 = vector.broadcast %208 : vector<1x32xf32> to vector<8x32xf32>
    %210 = arith.addf %206, %209 : vector<8x32xf32>
    %211 = arith.addf %192, %210 : vector<8x32xf32>
    %c0_98 = arith.constant 0 : index
    %c4 = arith.constant 4 : index
    %c0_99 = arith.constant 0 : index
    %212 = vector.load %arg13[%c0_98, %c4, %c0_99] : memref<1x6x32xf32, #tpu.memory_space<vmem>>, vector<1x1x32xf32>
    %213 = vector.shape_cast %212 : vector<1x1x32xf32> to vector<1x32xf32>
    %c0_100 = arith.constant 0 : index
    %c5 = arith.constant 5 : index
    %c0_101 = arith.constant 0 : index
    %214 = vector.load %arg13[%c0_100, %c5, %c0_101] : memref<1x6x32xf32, #tpu.memory_space<vmem>>, vector<1x1x32xf32>
    %215 = vector.shape_cast %214 : vector<1x1x32xf32> to vector<1x32xf32>
    %cst_102 = arith.constant dense<0.000000e+00> : vector<8xf32>
    %216 = vector.multi_reduction <add>, %211, %cst_102 [1] : vector<8x32xf32> to vector<8xf32>
    %217 = vector.shape_cast %216 : vector<8xf32> to vector<8x1xf32>
    %cst_103 = arith.constant 3.200000e+01 : f32
    %218 = vector.broadcast %cst_103 : f32 to vector<8x1xf32>
    %219 = arith.divf %217, %218 : vector<8x1xf32>
    %220 = vector.broadcast %219 : vector<8x1xf32> to vector<8x32xf32>
    %221 = arith.subf %211, %220 : vector<8x32xf32>
    %222 = arith.mulf %221, %221 : vector<8x32xf32>
    %cst_104 = arith.constant dense<0.000000e+00> : vector<8xf32>
    %223 = vector.multi_reduction <add>, %222, %cst_104 [1] : vector<8x32xf32> to vector<8xf32>
    %224 = vector.shape_cast %223 : vector<8xf32> to vector<8x1xf32>
    %cst_105 = arith.constant 3.200000e+01 : f32
    %225 = vector.broadcast %cst_105 : f32 to vector<8x1xf32>
    %226 = arith.divf %224, %225 : vector<8x1xf32>
    %227 = vector.broadcast %219 : vector<8x1xf32> to vector<8x32xf32>
    %228 = arith.subf %211, %227 : vector<8x32xf32>
    %cst_106 = arith.constant 9.99999974E-6 : f32
    %229 = vector.broadcast %cst_106 : f32 to vector<8x1xf32>
    %230 = arith.addf %226, %229 : vector<8x1xf32>
    %231 = math.rsqrt %230 : vector<8x1xf32>
    %232 = vector.broadcast %231 : vector<8x1xf32> to vector<8x32xf32>
    %233 = arith.mulf %228, %232 : vector<8x32xf32>
    %234 = vector.broadcast %213 : vector<1x32xf32> to vector<8x32xf32>
    %235 = arith.mulf %233, %234 : vector<8x32xf32>
    %236 = vector.broadcast %215 : vector<1x32xf32> to vector<8x32xf32>
    %237 = arith.addf %235, %236 : vector<8x32xf32>
    %c0_107 = arith.constant 0 : index
    %c0_108 = arith.constant 0 : index
    %238 = vector.load %arg17[%c0_107, %c0_108] : memref<8x32xf32, #tpu.memory_space<vmem>>, vector<8x32xf32>
    tpu.vector_store %arg17[%c0_107, %c0_108], %237 {strides = array<i32>} : memref<8x32xf32, #tpu.memory_space<vmem>>, vector<8x32xf32>,
    %239 = arith.addf %165, %164 : vector<12x16xf32>
    %c0_109 = arith.constant 0 : index
    %c1_110 = arith.constant 1 : index
    %c0_111 = arith.constant 0 : index
    %240 = vector.load %arg14[%c0_109, %c1_110, %c0_111] : memref<1x6x16xf32, #tpu.memory_space<vmem>>, vector<1x1x16xf32>
    %241 = vector.shape_cast %240 : vector<1x1x16xf32> to vector<1x16xf32>
    %c0_112 = arith.constant 0 : index
    %c2_113 = arith.constant 2 : index
    %c0_114 = arith.constant 0 : index
    %242 = vector.load %arg14[%c0_112, %c2_113, %c0_114] : memref<1x6x16xf32, #tpu.memory_space<vmem>>, vector<1x1x16xf32>
    %243 = vector.shape_cast %242 : vector<1x1x16xf32> to vector<1x16xf32>
    %cst_115 = arith.constant dense<0.000000e+00> : vector<12xf32>
    %244 = vector.multi_reduction <add>, %239, %cst_115 [1] : vector<12x16xf32> to vector<12xf32>
    %245 = vector.shape_cast %244 : vector<12xf32> to vector<12x1xf32>
    %cst_116 = arith.constant 1.600000e+01 : f32
    %246 = vector.broadcast %cst_116 : f32 to vector<12x1xf32>
    %247 = arith.divf %245, %246 : vector<12x1xf32>
    %248 = vector.broadcast %247 : vector<12x1xf32> to vector<12x16xf32>
    %249 = arith.subf %239, %248 : vector<12x16xf32>
    %250 = arith.mulf %249, %249 : vector<12x16xf32>
    %cst_117 = arith.constant dense<0.000000e+00> : vector<12xf32>
    %251 = vector.multi_reduction <add>, %250, %cst_117 [1] : vector<12x16xf32> to vector<12xf32>
    %252 = vector.shape_cast %251 : vector<12xf32> to vector<12x1xf32>
    %cst_118 = arith.constant 1.600000e+01 : f32
    %253 = vector.broadcast %cst_118 : f32 to vector<12x1xf32>
    %254 = arith.divf %252, %253 : vector<12x1xf32>
    %255 = vector.broadcast %247 : vector<12x1xf32> to vector<12x16xf32>
    %256 = arith.subf %239, %255 : vector<12x16xf32>
    %cst_119 = arith.constant 9.99999974E-6 : f32
    %257 = vector.broadcast %cst_119 : f32 to vector<12x1xf32>
    %258 = arith.addf %254, %257 : vector<12x1xf32>
    %259 = math.rsqrt %258 : vector<12x1xf32>
    %260 = vector.broadcast %259 : vector<12x1xf32> to vector<12x16xf32>
    %261 = arith.mulf %256, %260 : vector<12x16xf32>
    %262 = vector.broadcast %241 : vector<1x16xf32> to vector<12x16xf32>
    %263 = arith.mulf %261, %262 : vector<12x16xf32>
    %264 = vector.broadcast %243 : vector<1x16xf32> to vector<12x16xf32>
    %265 = arith.addf %263, %264 : vector<12x16xf32>
    %c0_120 = arith.constant 0 : index
    %c0_121 = arith.constant 0 : index
    %c0_122 = arith.constant 0 : index
    %266 = vector.load %arg12[%c0_120, %c0_121, %c0_122] : memref<1x16x64xbf16, #tpu.memory_space<vmem>>, vector<1x16x64xbf16>
    %267 = vector.shape_cast %266 : vector<1x16x64xbf16> to vector<16x64xbf16>
    %268 = arith.truncf %265 : vector<12x16xf32> to vector<12x16xbf16>
    %cst_123 = arith.constant dense<0.000000e+00> : vector<12x64xf32>
    %269 = tpu.matmul %268, %267, %cst_123 {dimension_numbers = #tpu.dot_dimension_numbers<[1], [0], [0], [1], [0, 0, 1, 1], [], []>} : vector<12x16xbf16>, vector<16x64xbf16>, vector<12x64xf32> -> vector<12x64xf32>
    %c0_124 = arith.constant 0 : index
    %c0_125 = arith.constant 0 : index
    %c0_126 = arith.constant 0 : index
    %270 = vector.load %arg16[%c0_124, %c0_125, %c0_126] : memref<1x1x64xf32, #tpu.memory_space<vmem>>, vector<1x1x64xf32>
    %271 = vector.shape_cast %270 : vector<1x1x64xf32> to vector<1x64xf32>
    %272 = vector.broadcast %271 : vector<1x64xf32> to vector<12x64xf32>
    %273 = arith.addf %269, %272 : vector<12x64xf32>
    %cst_127 = arith.constant 0.000000e+00 : f32
    %274 = vector.broadcast %cst_127 : f32 to vector<12x64xf32>
    %275 = arith.maximumf %273, %274 : vector<12x64xf32>
    %c0_128 = arith.constant 0 : index
    %c32 = arith.constant 32 : index
    %c0_129 = arith.constant 0 : index
    %276 = vector.load %arg11[%c0_128, %c32, %c0_129] : memref<1x96x16xbf16, #tpu.memory_space<vmem>>, vector<1x64x16xbf16>
    %277 = vector.shape_cast %276 : vector<1x64x16xbf16> to vector<64x16xbf16>
    %278 = arith.truncf %275 : vector<12x64xf32> to vector<12x64xbf16>
    %cst_130 = arith.constant dense<0.000000e+00> : vector<12x16xf32>
    %279 = tpu.matmul %278, %277, %cst_130 {dimension_numbers = #tpu.dot_dimension_numbers<[1], [0], [0], [1], [0, 0, 1, 1], [], []>} : vector<12x64xbf16>, vector<64x16xbf16>, vector<12x16xf32> -> vector<12x16xf32>
    %c0_131 = arith.constant 0 : index
    %c3_132 = arith.constant 3 : index
    %c0_133 = arith.constant 0 : index
    %280 = vector.load %arg14[%c0_131, %c3_132, %c0_133] : memref<1x6x16xf32, #tpu.memory_space<vmem>>, vector<1x1x16xf32>
    %281 = vector.shape_cast %280 : vector<1x1x16xf32> to vector<1x16xf32>
    %282 = vector.broadcast %281 : vector<1x16xf32> to vector<12x16xf32>
    %283 = arith.addf %279, %282 : vector<12x16xf32>
    %284 = arith.addf %265, %283 : vector<12x16xf32>
    %c0_134 = arith.constant 0 : index
    %c4_135 = arith.constant 4 : index
    %c0_136 = arith.constant 0 : index
    %285 = vector.load %arg14[%c0_134, %c4_135, %c0_136] : memref<1x6x16xf32, #tpu.memory_space<vmem>>, vector<1x1x16xf32>
    %286 = vector.shape_cast %285 : vector<1x1x16xf32> to vector<1x16xf32>
    %c0_137 = arith.constant 0 : index
    %c5_138 = arith.constant 5 : index
    %c0_139 = arith.constant 0 : index
    %287 = vector.load %arg14[%c0_137, %c5_138, %c0_139] : memref<1x6x16xf32, #tpu.memory_space<vmem>>, vector<1x1x16xf32>
    %288 = vector.shape_cast %287 : vector<1x1x16xf32> to vector<1x16xf32>
    %cst_140 = arith.constant dense<0.000000e+00> : vector<12xf32>
    %289 = vector.multi_reduction <add>, %284, %cst_140 [1] : vector<12x16xf32> to vector<12xf32>
    %290 = vector.shape_cast %289 : vector<12xf32> to vector<12x1xf32>
    %cst_141 = arith.constant 1.600000e+01 : f32
    %291 = vector.broadcast %cst_141 : f32 to vector<12x1xf32>
    %292 = arith.divf %290, %291 : vector<12x1xf32>
    %293 = vector.broadcast %292 : vector<12x1xf32> to vector<12x16xf32>
    %294 = arith.subf %284, %293 : vector<12x16xf32>
    %295 = arith.mulf %294, %294 : vector<12x16xf32>
    %cst_142 = arith.constant dense<0.000000e+00> : vector<12xf32>
    %296 = vector.multi_reduction <add>, %295, %cst_142 [1] : vector<12x16xf32> to vector<12xf32>
    %297 = vector.shape_cast %296 : vector<12xf32> to vector<12x1xf32>
    %cst_143 = arith.constant 1.600000e+01 : f32
    %298 = vector.broadcast %cst_143 : f32 to vector<12x1xf32>
    %299 = arith.divf %297, %298 : vector<12x1xf32>
    %300 = vector.broadcast %292 : vector<12x1xf32> to vector<12x16xf32>
    %301 = arith.subf %284, %300 : vector<12x16xf32>
    %cst_144 = arith.constant 9.99999974E-6 : f32
    %302 = vector.broadcast %cst_144 : f32 to vector<12x1xf32>
    %303 = arith.addf %299, %302 : vector<12x1xf32>
    %304 = math.rsqrt %303 : vector<12x1xf32>
    %305 = vector.broadcast %304 : vector<12x1xf32> to vector<12x16xf32>
    %306 = arith.mulf %301, %305 : vector<12x16xf32>
    %307 = vector.broadcast %286 : vector<1x16xf32> to vector<12x16xf32>
    %308 = arith.mulf %306, %307 : vector<12x16xf32>
    %309 = vector.broadcast %288 : vector<1x16xf32> to vector<12x16xf32>
    %310 = arith.addf %308, %309 : vector<12x16xf32>
    %c0_145 = arith.constant 0 : index
    %c0_146 = arith.constant 0 : index
    %311 = vector.load %arg18[%c0_145, %c0_146] : memref<12x16xf32, #tpu.memory_space<vmem>>, vector<12x16xf32>
    tpu.vector_store %arg18[%c0_145, %c0_146], %310 {strides = array<i32>} : memref<12x16xf32, #tpu.memory_space<vmem>>, vector<12x16xf32>,
    return
  }
  func.func @transform_0(%arg0: i32) -> (i32, i32) {
    %c0_i32 = arith.constant 0 : i32
    %c0_i32_0 = arith.constant 0 : i32
    %c0_i32_1 = arith.constant 0 : i32
    return %c0_i32, %c0_i32_0 : i32, i32
  }
  func.func @transform_1(%arg0: i32) -> (i32, i32) {
    %c0_i32 = arith.constant 0 : i32
    %c0_i32_0 = arith.constant 0 : i32
    %c0_i32_1 = arith.constant 0 : i32
    return %c0_i32, %c0_i32_0 : i32, i32
  }
  func.func @transform_2(%arg0: i32) -> (i32, i32) {
    %c0_i32 = arith.constant 0 : i32
    %c0_i32_0 = arith.constant 0 : i32
    %c0_i32_1 = arith.constant 0 : i32
    return %c0_i32, %c0_i32_0 : i32, i32
  }
  func.func @transform_3(%arg0: i32) -> (i32, i32) {
    %c0_i32 = arith.constant 0 : i32
    %c0_i32_0 = arith.constant 0 : i32
    %c0_i32_1 = arith.constant 0 : i32
    return %c0_i32, %c0_i32_0 : i32, i32
  }
  func.func @transform_4(%arg0: i32) -> (i32, i32) {
    %c0_i32 = arith.constant 0 : i32
    %c0_i32_0 = arith.constant 0 : i32
    %c0_i32_1 = arith.constant 0 : i32
    return %c0_i32, %c0_i32_0 : i32, i32
  }
  func.func @transform_5(%arg0: i32) -> (i32, i32) {
    %c0_i32 = arith.constant 0 : i32
    %c0_i32_0 = arith.constant 0 : i32
    %c0_i32_1 = arith.constant 0 : i32
    return %c0_i32, %c0_i32_0 : i32, i32
  }
  func.func @transform_6(%arg0: i32) -> (i32, i32, i32) {
    %c0_i32 = arith.constant 0 : i32
    %c0_i32_0 = arith.constant 0 : i32
    %c0_i32_1 = arith.constant 0 : i32
    return %arg0, %c0_i32, %c0_i32_0 : i32, i32, i32
  }
  func.func @transform_7(%arg0: i32) -> (i32, i32, i32) {
    %c0_i32 = arith.constant 0 : i32
    %c0_i32_0 = arith.constant 0 : i32
    %c0_i32_1 = arith.constant 0 : i32
    return %arg0, %c0_i32, %c0_i32_0 : i32, i32, i32
  }
  func.func @transform_8(%arg0: i32) -> (i32, i32, i32) {
    %c0_i32 = arith.constant 0 : i32
    %c0_i32_0 = arith.constant 0 : i32
    %c0_i32_1 = arith.constant 0 : i32
    return %arg0, %c0_i32, %c0_i32_0 : i32, i32, i32
  }
  func.func @transform_9(%arg0: i32) -> (i32, i32, i32) {
    %c0_i32 = arith.constant 0 : i32
    %c0_i32_0 = arith.constant 0 : i32
    %c0_i32_1 = arith.constant 0 : i32
    return %arg0, %c0_i32, %c0_i32_0 : i32, i32, i32
  }
  func.func @transform_10(%arg0: i32) -> (i32, i32, i32) {
    %c0_i32 = arith.constant 0 : i32
    %c0_i32_0 = arith.constant 0 : i32
    %c0_i32_1 = arith.constant 0 : i32
    return %arg0, %c0_i32, %c0_i32_0 : i32, i32, i32
  }
  func.func @transform_11(%arg0: i32) -> (i32, i32, i32) {
    %c0_i32 = arith.constant 0 : i32
    %c0_i32_0 = arith.constant 0 : i32
    %c0_i32_1 = arith.constant 0 : i32
    return %arg0, %c0_i32, %c0_i32_0 : i32, i32, i32
  }
  func.func @transform_12(%arg0: i32) -> (i32, i32, i32) {
    %c0_i32 = arith.constant 0 : i32
    %c0_i32_0 = arith.constant 0 : i32
    %c0_i32_1 = arith.constant 0 : i32
    return %arg0, %c0_i32, %c0_i32_0 : i32, i32, i32
  }
  func.func @transform_13(%arg0: i32) -> (i32, i32, i32) {
    %c0_i32 = arith.constant 0 : i32
    %c0_i32_0 = arith.constant 0 : i32
    %c0_i32_1 = arith.constant 0 : i32
    return %arg0, %c0_i32, %c0_i32_0 : i32, i32, i32
  }
  func.func @transform_14(%arg0: i32) -> (i32, i32, i32) {
    %c0_i32 = arith.constant 0 : i32
    %c0_i32_0 = arith.constant 0 : i32
    %c0_i32_1 = arith.constant 0 : i32
    return %arg0, %c0_i32, %c0_i32_0 : i32, i32, i32
  }
  func.func @transform_15(%arg0: i32) -> (i32, i32, i32) {
    %c0_i32 = arith.constant 0 : i32
    %c0_i32_0 = arith.constant 0 : i32
    %c0_i32_1 = arith.constant 0 : i32
    return %arg0, %c0_i32, %c0_i32_0 : i32, i32, i32
  }
  func.func @transform_16(%arg0: i32) -> (i32, i32) {
    %c0_i32 = arith.constant 0 : i32
    %c0_i32_0 = arith.constant 0 : i32
    %c0_i32_1 = arith.constant 0 : i32
    return %c0_i32, %c0_i32_0 : i32, i32
  }
  func.func @transform_17(%arg0: i32) -> (i32, i32) {
    %c0_i32 = arith.constant 0 : i32
    %c0_i32_0 = arith.constant 0 : i32
    %c0_i32_1 = arith.constant 0 : i32
    return %c0_i32, %c0_i32_0 : i32, i32
  }
}

</mosaic_0001>

<bundles_post_ra>
// kernel: graph_attn_encoder.1
= control target key start
LH: loop header
LB: loop body
LE: loop exit
PB: predicated region body
PF: predicated region fallthrough
CT: control target
= control target key end

     0   :  { %s3858_s0 = inlined_call_operand.hbm [shape: f32[8,32], index: 0, kind: input, shape index: {}, may-alias: {0,16}]   ;;  %s3859_s1 = inlined_call_operand.hbm [shape: f32[12,16], index: 1, kind: input, shape index: {}, may-alias: {1,17}]   ;;  %s3860_s2 = inlined_call_operand.vmem [shape: s32[12,1], index: 2, kind: input, shape index: {}]   ;;  %s3861_s3 = inlined_call_operand.vmem [shape: s32[12,1], index: 3, kind: input, shape index: {}]   ;;  %s3862_s4 = inlined_call_operand.vmem [shape: s32[1,12], index: 4, kind: input, shape index: {}]   ;;  %s3863_s5 = inlined_call_operand.vmem [shape: f32[4,32], index: 5, kind: input, shape index: {}]   ;;  %s3864_s6 = inlined_call_operand.vmem [shape: bf16[5,32,40], index: 6, kind: input, shape index: {}]   ;;  %s3865_s7 = inlined_call_operand.vmem [shape: bf16[5,16,4], index: 7, kind: input, shape index: {}]   ;;  %s3866_s8 = inlined_call_operand.vmem [shape: bf16[5,32,128], index: 8, kind: input, shape index: {}]   ;;  %s3867_s9 = inlined_call_operand.vmem [shape: bf16[5,128,32], index: 9, kind: input, shape index: {}]   ;;  %s3868_s10 = inlined_call_operand.vmem [shape: bf16[5,96,16], index: 10, kind: input, shape index: {}]   ;;  %s3869_s11 = inlined_call_operand.vmem [shape: bf16[5,16,64], index: 11, kind: input, shape index: {}]   ;;  %s3870_s12 = inlined_call_operand.vmem [shape: f32[5,6,32], index: 12, kind: input, shape index: {}]   ;;  %s3871_s13 = inlined_call_operand.vmem [shape: f32[5,6,16], index: 13, kind: input, shape index: {}]   ;;  %s3872_s14 = inlined_call_operand.vmem [shape: f32[5,1,128], index: 14, kind: input, shape index: {}]   ;;  %s3873_s15 = inlined_call_operand.vmem [shape: f32[5,1,64], index: 15, kind: input, shape index: {}]   ;;  %s3874_s16 = inlined_call_operand.hbm [shape: f32[8,32], index: 16, kind: output, shape index: {0}, may-alias: {0,16}]   ;;  %s3875_s17 = inlined_call_operand.hbm [shape: f32[12,16], index: 17, kind: output, shape index: {1}, may-alias: {1,17}]  }
   0x1   :  { %3881 = sst [smem:[#allocation22_spill]] %s3858_s0 }
   0x2   :  { %3882 = sst [smem:[#allocation23_spill]] %s3859_s1 }
   0x3   :  { %3883 = sst [smem:[#allocation24_spill]] %s3860_s2 }
   0x4   :  { %3884 = sst [smem:[#allocation25_spill]] %s3863_s5 }
   0x5   :  { %3885 = sst [smem:[#allocation26_spill]] %s3864_s6 }
   0x6   :  { %3886 = sst [smem:[#allocation27_spill]] %s3874_s16 }
   0x7   :  { %3887 = sst [smem:[#allocation28_spill]] %s3875_s17 }
   0x8   :  { %23 = vsyncpa [#allocation9], 0 }
   0x9   :  { %24 = vsyncpa [#allocation12], 0 }
   0xa   :  { %25 = vsyncpa [#allocation10], 0 }
   0xb   :  { %26 = vsyncpa [#allocation15], 0  ;;  %s3460_s24 = smov 0  }
   0xc LB: > { %3888 = sst [smem:[#allocation20_spill]] %s3346_s24  ;;  %s3466_s25 = sadd.s32 4294967295, %s3346_s24   ;;  %s3346_s24 = sphi %s3460_s24, %s32_s24  }
   0xd   : > { %p2805_p0 = scmp.ge.s32.totalorder %s3346_s24, 1  ;;  %p465_p1 = scmp.lt.s32.totalorder %s3346_s24, 6 }
   0xe   : > { %p3876_p3 = scmp.eq.s32.totalorder %s3466_s25, 0  ;;  %s3348_s26 = smov [#allocation8]  }
   0xf   : > { %s478_s27 = sshll.u32 %s3348_s26, 4  ;;  %p3472_p4 = pnand %p2805_p0, %p465_p1  ;;  %s479_s27 = int_to_ptr.vmem [resolvable:$true] %s478_s27 }
  0x10   : > { %s3349_s29 = smov [#allocation11]   ;;  %s3235_s18 = scalar_lea.vmem %s479_s27, 128 }
  0x11   : > { %s3889_s28 = scalar_select %p3472_p4, 1, 0 }
  0x12   : > { %p3126_p5 = pneg %p3472_p4  ;;  %s488_s0 = sshll.u32 %s3349_s29, 4  ;;  %s489_s0 = int_to_ptr.vmem [resolvable:$true] %s488_s0 }
  0x13   : > { %p3236_p8 = scmp.ne.s32.totalorder %s479_s27, %s3235_s18  ;;  %p3243_p11 = scmp.lt.s32.totalorder %s479_s27, %s479_s27 }
  0x14   : > { %p3480_p6 = pnand %p3876_p3, %p3126_p5  ;;  %p3244_p12 = scmp.lt.s32.totalorder %s3235_s18, %s3235_s18 }
  0x16   : > { %p3226_p7 = pneg %p3480_p6  ;;  %p3245_p13 = por %p3244_p12, %p3243_p11 }
  0x18   : > { %p3238_p9 = pnand %p3236_p8, %p3226_p7 }
  0x1a   : > { %p3239_p10 = pneg %p3238_p9 }
  0x1c   : > { %p3246_p0 = pnand %p3245_p13, %p3239_p10 }
  0x1e   : > { %3249 = shalt.err (!%p3246_p0)
}
  0x1f   : > { %s3891_s20 = sld [smem:[#allocation22_spill]]  ;;  %s3261_s21 = scalar_lea.vmem %s489_s0, 256 }
  0x20   : > { %p3262_p1 = scmp.ne.s32.totalorder %s489_s0, %s3261_s21  ;;  %p3269_p8 = scmp.lt.s32.totalorder %s489_s0, %s489_s0 }
  0x21   : > { %p3270_p9 = scmp.lt.s32.totalorder %s3261_s21, %s3261_s21 }
  0x22   : > { %p3264_p5 = pnand %p3262_p1, %p3226_p7 }
  0x23   : > { %p3271_p3 = por %p3270_p9, %p3269_p8 }
  0x24   : > { %p3265_p2 = pneg %p3264_p5 }
  0x25   : > { %3129 = dma.hbm_to_vmem [thread:$0]  (!%p3480_p6), %s3891_s20, 128, %s479_s27, [#allocation9]  }
  0x26   : > { %p3272_p4 = pnand %p3271_p3, %p3265_p2 }
  0x28   : > { %3275 = shalt.err (!%p3272_p4)
}
  0x29   : > { %s3350_s22 = smov 128   ;;  %s3351_s23 = smov 8  }
  0x2a   : > { %s3892_s18 = sld [smem:[#allocation23_spill]]  ;;  %p3893_p10 = scmp.ne.s32.totalorder %s3889_s28, 0 }
  0x2c   : > { %590 = sbr.rel (%p3893_p10) target bundleno = 3181 (0xc6d), region = 84 }
  0x30   : > { %3132 = dma.hbm_to_vmem [thread:$0]  (!%p3480_p6), %s3892_s18, 256, %s489_s0, [#allocation12], %s3350_s22, %s3350_s22, %s3351_s23  }
  0x31   : > { %p3894_p11 = scmp.eq.s32.totalorder %s3466_s25, 0 }
  0x33   : > { %3329 = dma.done.wait (%p3894_p11), [#allocation9], 128   ;;  %p3895_p7 = pmov %p3894_p11 }
  0x35   : > { %3331 = vsyncadd (%p3895_p7), [#allocation9], 4294967168  ;;  %p3896_p2 = pmov %p3895_p7 }
  0x37   : > { %3333 = dma.done.wait (%p3896_p2), [#allocation12], 256   ;;  %p3897_p3 = pmov %p3896_p2 }
  0x38   : > { %p680_p4 = scmp.lt.s32.totalorder %s3466_s25, 4  ;;  %s3898_s6 = sld [smem:[#allocation26_spill]] }
  0x39   : > { %3335 = vsyncadd (%p3897_p3), [#allocation12], 4294967040  ;;  %p3900_p6 = scmp.ne.s32.totalorder %s3466_s25, 0 }
  0x3a   : > { %s3514_s27 = scalar_select %p680_p4, %s3466_s25, 4 }
  0x3b   : > { %s3901_s26 = sld [smem:[#allocation24_spill]] (!%p3900_p6) }
  0x3c   : > { %s2899_s28 = sshll.u32 %s3514_s27, 4  ;;  %s3518_s0 = sshll.u32 %s3514_s27, 3 }
  0x3d   : > { %s3532_s29 = scalar_lea.vmem %s3866_s8, %s2899_s28  ;;  %s2902_s18 = sshll.u32 %s3514_s27, 6 }
  0x3e   : > { %s3523_s1 = scalar_lea.vmem %s3898_s6, %s2899_s28  ;;  %s3538_s30 = scalar_lea.vmem %s3867_s9, %s2902_s18 }
  0x3f   : > { %3899 = sst [smem:[#allocation21_spill]] %s3523_s1  ;;  %s3109_s19 = smul.u32 48, %s3514_s27 }
  0x40   : > { %s3549_s20 = scalar_lea.vmem %s3870_s12, %s3518_s0  ;;  %s3560_s17 = scalar_lea.vmem %s3871_s13, %s3518_s0 }
  0x41   : > { %s3554_s28 = scalar_lea.vmem %s3868_s10, %s3109_s19  ;;  %s720_s5 = scalar_lea.vmem %s3872_s14, %s3514_s27 }
  0x42   : > { %s723_s2 = scalar_lea.vmem %s3873_s15, %s3514_s27  ;;  %728 = sbr.rel (%p3900_p6) target bundleno = 287 (0x11f), region = 96 }
  0x47   : > { %v729_v0 = vld [vmem:[#allocation8] sm:$0xff]  ;;  %vm730_vm0 = vcmask 261120   ;;  %v732_v1 = vld [vmem:[#allocation11] sm:$0xff]  ;;  %v733_v2 = vld [vmem:[#allocation11 + $0x8] sm:$0xf]  ;;  %vm734_vm1 = vcmask 130048   ;;  %v738_v3 = vlaneseq }
  0x48   : > { %731 = vst.msk [vmem:[#allocation13] sm:$0xff] %vm730_vm0, %v729_v0  ;;  %vm736_vm2 = vcmask 125952   ;;  %vm788_vm3 = vcmask 1043456   ;;  %v2826_v4 = vld [vmem:[%s3862_s4] ss:$0 sm:$0xff]  ;;  %v3352_v5 = vmov 0.0  }
  0x49   : > { %735 = vst.msk [vmem:[#allocation14] sm:$0xff] %vm734_vm1, %v732_v1  ;;  %2967 = vmatprep.subr.mxu0 %v3352_v5  ;;  %v739_v6 = vand.u32 127, %v738_v3  ;;  %v776_v7 = vshrl.u32 %v738_v3, 7  ;;  %v3353_v8 = vmov 1.0   ;;  %vm3354_vm4 = vmmov 0   ;;  %v752_v9 = vld [vmem:[%s3861_s3] sm:$0xff] }
  0x4a   : > { %737 = vst.msk [vmem:[#allocation14 + $0x8] sm:$0xf] %vm736_vm2, %v733_v2  ;;  %2968 = vmatpush3.msk.msra.mxu0 %vm788_vm3, %v3353_v8  ;;  %2971 = vmatprep.mubr.msk.f32.mxu0 %vm3354_vm4, %v3352_v5  ;;  %vm783_vm5 = vcmask 97280   ;;  %v3355_v11 = vmov 0   ;;  %v740_v12 = vld [vmem:[%s3901_s26] sm:$0xff]  ;;  %vm873_vm8 = vcmask 93184  }
  0x4b   : > { %2969 = vmatprep.subr.mxu0 %v3352_v5  ;;  %vm781_vm6 = vcmp.eq.s32.totalorder %v2826_v4, %v776_v7  ;;  %v867_v10 = vadd.s32 8, %v776_v7  ;;  %vm868_vm7 = vcmp.eq.s32.totalorder %v776_v7, %v739_v6  ;;  %3172 = vset.pattern.permute.xlu1 %v3355_v11  ;;  %v753_v16 = vld [vmem:[%s3861_s3 + $0x8] sm:$0xf]  ;;  %vm764_vm10 = vcmask 64512  }
  0x4c   : > { %2970 = vmatpush3.msra.mxu0 %v3353_v8  ;;  %v782_v13 = vsel %vm781_vm6, 1.0, %v3352_v5  ;;  %v870_v14 = vsel %vm868_vm7, 1.0, %v3352_v5  ;;  %3171 = vset.pattern.permute.xlu0 %v3355_v11  ;;  %v741_v17 = vld [vmem:[%s3901_s26 + $0x8] sm:$0xf]  ;;  %vm766_vm13 = vcmask 60416   ;;  %vm865_vm0 = vcmask 7168  }
  0x4d   : > { %784 = vst.msk [vmem:[#allocation5] sm:$0xff] %vm783_vm5, %v782_v13  ;;  %2972 = vmatmul.mubr.msk.f32.vlgmr.msra.gmra.mxu0 %vm783_vm5, %v782_v13  ;;  %vm869_vm9 = vcmp.eq.s32.totalorder %v867_v10, %v739_v6  ;;  %872 = vst.msk [vmem:[#allocation7] sm:$0xff] %vm783_vm5, %v870_v14  ;;  %755 = vperm.xlu1 %3172, %v752_v9  }
  0x4e   : > { %v871_v15 = vsel %vm869_vm9, 1.0, %v3352_v5  ;;  %743 = vperm.xlu0 %3171, %v740_v12  }
  0x4f   : > { %874 = vst.msk [vmem:[#allocation7 + $0x8] sm:$0xf] %vm873_vm8, %v871_v15 }
  0x51   : > { %758 = vperm.xlu1 %3172, %v753_v16  }
  0x52   : > { %746 = vperm.xlu0 %3171, %v741_v17  }
  0xc8   : > { %v756_v18 = vpop.permute.xlu1 %755 }
  0xc9   : > { %vm760_vm11 = vcmp.eq.s32.totalorder %v756_v18, %v739_v6  ;;  %v744_v19 = vpop.permute.xlu0 %743 }
  0xca   : > { %v762_v20 = vsel %vm760_vm11, 1.0, %v3352_v5  ;;  %vm748_vm12 = vcmp.eq.s32.totalorder %v744_v19, %v739_v6 }
  0xcb   : > { %768 = vst.msk [vmem:[#allocation3] sm:$0xff] %vm764_vm10, %v762_v20  ;;  %v750_v21 = vsel %vm748_vm12, 1.0, %v3352_v5 }
  0xcc   : > { %765 = vst.msk [vmem:[#allocation2] sm:$0xff] %vm764_vm10, %v750_v21  ;;  %v770_v22 = vadd.f32 %v762_v20, %v750_v21  ;;  %v759_v23 = vpop.permute.xlu1 %758 }
  0xcd   : > { %vm761_vm14 = vcmp.eq.s32.totalorder %v759_v23, %v739_v6  ;;  %v747_v24 = vpop.permute.xlu0 %746 }
  0xce   : > { %772 = vst.msk [vmem:[#allocation4] sm:$0xff] %vm764_vm10, %v770_v22  ;;  %v763_v25 = vsel %vm761_vm14, 1.0, %v3352_v5  ;;  %vm749_vm15 = vcmp.eq.s32.totalorder %v747_v24, %v739_v6 }
  0xcf   : > { %769 = vst.msk [vmem:[#allocation3 + $0x8] sm:$0xf] %vm766_vm13, %v763_v25  ;;  %v751_v26 = vsel %vm749_vm15, 1.0, %v3352_v5 }
  0xd0   : > { %767 = vst.msk [vmem:[#allocation2 + $0x8] sm:$0xf] %vm766_vm13, %v751_v26  ;;  %v771_v27 = vadd.f32 %v763_v25, %v751_v26 }
  0xd2   : > { %773 = vst.msk [vmem:[#allocation4 + $0x8] sm:$0xf] %vm766_vm13, %v771_v27 }
 0x10d   : > { %v858_v28 = vpop.f32.mrf.mxu0 }
 0x10e   : > { %v862_v29 = vmax.f32 %v858_v28, 1.0 }
 0x10f   : > { %v2973_v30 = vpop.f32.mrf.mxu0 }
 0x110   : > { %3173 = vrcp.f32 %v862_v29 }
 0x11d   : > { %v3174_v31 = vpop.eup %3173 }
 0x11e   : > { %866 = vst.msk [vmem:[#allocation6] sm:$0xff] %vm865_vm0, %v3174_v31 }
 0x11f PF: > { %s3902_s22 = sld [smem:[#allocation21_spill]]  ;;  %v3356_v33 = vmov 0.0   ;;  %vm3357_vm1 = vmmov 0   ;;  %v3596_v35 = vld [vmem:[#allocation13] sm:$0xff]  ;;  %vm985_vm2 = vcmask 261120   ;;  %vm887_vm3 = vcmask 1043456   ;;  %s3903_s21 = scalar_lea.vmem %s3865_s7, %s3518_s0 }
 0x120   : > { %2981 = vmatprep.subr.bf16.mxu1 %v3356_v33  ;;  %2974 = vmatprep.subr.mxu0 %v3356_v33  ;;  %v3598_v36 = vld [vmem:[#allocation14 + $0x8] sm:$0xf]  ;;  %v3600_v37 = vld [vmem:[#allocation14] sm:$0xff]  ;;  %vm883_vm4 = vcmask 97280   ;;  %v972_v39 = vpack.c.bf16 %v3596_v35, %v3596_v35  ;;  %v3186_v41 = vld [vmem:[%s3903_s21] sm:$0xff]   ;;  %v3358_v43 = vmov 0   ;;  %s3905_s21 = scalar_lea.vmem %s3869_s11, %s3518_s0 }
 0x121   : > { %2985 = vmatprep.mubr.msk.bf16.mxu1 %vm3357_vm1, %v3356_v33  ;;  %2975 = vmatpush3.msk.msra.mxu0 %vm887_vm3, %v3598_v36  ;;  %v3605_v38 = vld [vmem:[#allocation5] sm:$0xff]  ;;  %v1031_v42 = vpack.c.bf16 %v3598_v36, %v3600_v37  ;;  %vm1038_vm5 = vcmask 130048   ;;  %vm1131_vm6 = vcmask 64512   ;;  %s3359_s23 = smov 92   ;;  %s3360_s24 = smov 96   ;;  %v3642_v60 = vld [vmem:[#allocation2] sm:$0xff] }
 0x122   : > { %2976 = vmatprep.subr.mxu0 %v3356_v33  ;;  %2978 = vmatprep.mubr.msk.f32.mxu0 %vm3357_vm1, %v3356_v33  ;;  %v880_v44 = vld [vmem:[#allocation3] sm:$0xff]  ;;  %v3640_v59 = vld [vmem:[#allocation3 + $0x8] sm:$0xf]  ;;  %v3648_v62 = vld [vmem:[#allocation2 + $0x8] sm:$0xf]  ;;  %v3361_v63 = vmov 1  }
 0x123   : > { %2977 = vmatpush3.msra.mxu0 %v3600_v37  ;;  %3175 = vset.pattern.permute.xlu1 %v3358_v43  ;;  %v3362_v15 = vmov 2   ;;  %v3363_v17 = vmov 3   ;;  %s3364_s18 = smov 124   ;;  %s3365_s16 = smov 32   ;;  %v1317_v20 = vld [vmem:[#allocation7] sm:$0xff]  ;;  %vm1334_vm9 = vcmask 93184  }
 0x124   : > { %2979 = vmatmul.mubr.msk.f32.vlgmr.msra.gmra.mxu0 %vm883_vm4, %v3605_v38  ;;  %2989 = vmatprep.subr.bf16.mxu0 %v3356_v33  ;;  %v1318_v21 = vld [vmem:[#allocation7 + $0x8] sm:$0xf]  ;;  %vm1343_vm10 = vcmp.gt.f32.partialorder %v3605_v38, 0.0  ;;  %s3904_s6 = sld [smem:[#allocation25_spill]]  ;;  %vm1683_vm0 = vcmask 31744   ;;  %p3137_p12 = scmp.eq.s32.totalorder %s3466_s25, 4 }
 0x125   : > { %v3184_v32 = vld [vmem:[%s3902_s22 + $0x8] sm:$0xff]   ;;  %v3185_v34 = vld [vmem:[%s3902_s22] sm:$0xff]   ;;  %2991 = vmatprep.mubr.msk.bf16.mxu0 %vm3357_vm1, %v3356_v33  ;;  %v961_v40 = vld [vmem:[#allocation6] sm:$0xff]  ;;  %3176 = vset.pattern.permute.xlu0 %v3358_v43  ;;  %s3366_s27 = smov [#allocation13]  }
 0x126   : > { %2982 = vmatpush3.bf16.msra.mxu1 %v3184_v32  ;;  %964 = vperm.xlu1 %3175, %v961_v40  }
 0x127   : > { %2983 = vmatprep.subr.bf16.mxu1 %v3356_v33  ;;  %2990 = vmatpush3.bf16.msra.mxu0 %v3186_v41 }
 0x128   : > { %2995 = vmatprep.subr.bf16.mxu0 %v3356_v33 }
 0x12a   : > { %2984 = vmatpush3.bf16.msra.mxu1 %v3185_v34  ;;  %2992 = vmatmul.mubr.msk.bf16.vlgmr.msra.gmra.mxu0 %vm1038_vm5, %v1031_v42 }
 0x12b   : > { %2996 = vmatpush3.bf16.msra.mxu0 %v3186_v41  ;;  %2997 = vmatprep.mubr.msk.bf16.mxu0 %vm3357_vm1, %v3356_v33 }
 0x12c   : > { %3177 = vset.pattern.permute.xlu1 %v3361_v63 }
 0x12d   : > { %2986 = vmatmul.mubr.msk.bf16.vlgmr.msra.gmra.mxu1 %vm985_vm2, %v972_v39 }
 0x12e   : > { %3003 = vmatprep.mubr.msk.f32.mxu1 %vm1131_vm6, %v880_v44 }
 0x1a1   : > { %v965_v49 = vpop.permute.xlu1 %964 }
 0x1e4   : > { %v957_v45 = vpop.f32.mrf.mxu0 }
 0x1e5   : > { %v967_v51 = vmul.f32 %v965_v49, %v957_v45 }
 0x1e6   : > { %v2980_v46 = vpop.f32.mrf.mxu0 }
 0x1e7   : > { %v1083_v53 = vpack.c.bf16 %v967_v51, %v967_v51 }
 0x1e9   : > { %2998 = vmatmul.mubr.msk.bf16.vlgmr.msra.gmra.mxu0 %vm1038_vm5, %v1083_v53 }
 0x1ea   : > { %3013 = vmatprep.mubr.msk.f32.mxu0 %vm1131_vm6, %v880_v44  ;;  %v1076_v54 = vpop.f32.mrf.mxu0 }
 0x1ec   : > { %v2993_v55 = vpop.f32.mrf.mxu0 }
 0x1ed   : > { %v3633_v47 = vpop.f32.mrf.mxu1 }
 0x1ee   : > { %1128 = vrot.lane.b32.xlu0 %v3633_v47, %s3359_s23  ;;  %v1079_v56 = vpop.f32.mrf.mxu0 }
 0x1ef   : > { %v2987_v48 = vpop.f32.mrf.mxu1 }
 0x1f0   : > { %v2994_v57 = vpop.f32.mrf.mxu0 }
 0x1f1   : > { %v1026_v50 = vpop.f32.mrf.mxu1 }
 0x1f2   : > { %1213 = vrot.lane.b32.xlu0 %v3633_v47, %s3360_s24 }
 0x1f3   : > { %v2988_v52 = vpop.f32.mrf.mxu1 }
 0x260   : > { %v1129_v58 = vpop.permute.xlu0 %1128 }
 0x261   : > { %3001 = vmatprep.subr.mxu1 %v1129_v58 }
 0x262   : > { %3002 = vmatpush3.msra.mxu1 %v1129_v58 }
 0x263   : > { %3004 = vmatmul.mubr.msk.f32.vlgmr.msra.gmra.mxu1 %vm1131_vm6, %v3640_v59 }
 0x264   : > { %v1214_v61 = vpop.permute.xlu0 %1213  ;;  %3008 = vmatprep.mubr.msk.f32.mxu1 %vm1131_vm6, %v3642_v60 }
 0x265   : > { %3006 = vmatprep.subr.mxu1 %v1214_v61 }
 0x266   : > { %3007 = vmatpush3.msra.mxu1 %v1214_v61 }
 0x267   : > { %3009 = vmatmul.mubr.msk.f32.vlgmr.msra.gmra.mxu1 %vm1131_vm6, %v3648_v62  ;;  %3016 = vmatprep.subr.mxu1 %v3356_v33 }
 0x268   : > { %3020 = vmatprep.mubr.msk.f32.mxu1 %vm3357_vm1, %v3356_v33 }
 0x2a9   : > { %v1121_v0 = vpop.f32.mrf.mxu0 }
 0x2ab   : > { %v2999_v1 = vpop.f32.mrf.mxu0 }
 0x2ad   : > { %v1124_v2 = vpop.f32.mrf.mxu0 }
 0x2af   : > { %v3000_v3 = vpop.f32.mrf.mxu0 }
 0x323   : > { %v3005_v4 = vpop.f32.mrf.mxu1 }
 0x325   : > { %v1204_v5 = vpop.f32.mrf.mxu1 }
 0x327   : > { %v3010_v6 = vpop.f32.mrf.mxu1 }
 0x328   : > { %v1294_v7 = vadd.f32 %v3010_v6, %v3005_v4 }
 0x329   : > { %v1288_v8 = vpop.f32.mrf.mxu1 }
 0x32a   : > { %v1298_v9 = vadd.f32 %v1294_v7, %v1079_v56  ;;  %v1289_v10 = vadd.f32 %v1288_v8, %v1204_v5 }
 0x32c   : > { %vm1300_vm7 = vcmp.gt.f32.partialorder %v1298_v9, 0.0  ;;  %v1302_v11 = vmul.f32 0.2, %v1298_v9  ;;  %v1297_v12 = vadd.f32 %v1289_v10, %v1076_v54 }
 0x32e   : > { %v3655_v13 = vsel %vm1300_vm7, %v1298_v9, %v1302_v11  ;;  %v1301_v14 = vmul.f32 0.2, %v1297_v12  ;;  %vm1299_vm8 = vcmp.gt.f32.partialorder %v1297_v12, 0.0 }
 0x32f   : > { %1357 = vperm.xlu1 %3177, %v3655_v13   ;;  %1328 = vperm.xlu0 %3176, %v3655_v13  }
 0x330   : > { %v3659_v16 = vsel %vm1299_vm8, %v1297_v12, %v1301_v14 }
 0x333   : > { %3178 = vset.pattern.permute.xlu1 %v3362_v15  ;;  %3181 = vset.pattern.permute.xlu0 %v3362_v15 }
 0x334   : > { %1385 = vperm.xlu1 %3178, %v3655_v13   ;;  %1381 = vperm.xlu0 %3181, %v3659_v16  }
 0x338   : > { %3179 = vset.pattern.permute.xlu1 %v3358_v43  ;;  %3183 = vset.pattern.permute.xlu0 %v3363_v17 }
 0x339   : > { %1413 = vperm.xlu0 %3183, %v3655_v13   ;;  %1323 = vperm.xlu1 %3179, %v3659_v16  }
 0x33d   : > { %3180 = vset.pattern.permute.xlu1 %v3361_v63 }
 0x33e   : > { %1353 = vperm.xlu1 %3180, %v3659_v16  }
 0x342   : > { %3182 = vset.pattern.permute.xlu1 %v3363_v17 }
 0x343   : > { %1409 = vperm.xlu1 %3182, %v3659_v16  }
 0x347   : > { %1305 = vrot.lane.b32.xlu1 %v3633_v47, %s3364_s18 }
 0x34b   : > { %1310 = vrot.lane.b32.xlu1 %v1121_v0, %s3365_s16 }
 0x3aa   : > { %v1358_v18 = vpop.permute.xlu1 %1357  ;;  %v1329_v19 = vpop.permute.xlu0 %1328 }
 0x3ab   : > { %v1332_v28 = vmul.f32 %v1329_v19, %v1318_v21  ;;  %v1361_v41 = vmul.f32 %v1358_v18, %v1318_v21 }
 0x3ad   : > { %v1335_v34 = vsel %vm1334_vm9, %v1332_v28, 0.0  ;;  %v1363_v49 = vsel %vm1334_vm9, %v1361_v41, 0.0 }
 0x3af   : > { %v1386_v22 = vpop.permute.xlu1 %1385  ;;  %v1382_v23 = vpop.permute.xlu0 %1381 }
 0x3b0   : > { %v1389_v24 = vmul.f32 %v1386_v22, %v1318_v21  ;;  %v1388_v25 = vmul.f32 %v1382_v23, %v1317_v20 }
 0x3b2   : > { %v1391_v26 = vsel %vm1334_vm9, %v1389_v24, 0.0  ;;  %v1390_v27 = vsel %vm883_vm4, %v1388_v25, 0.0 }
 0x3b3   : > { %v1392_v29 = vadd.f32 %v1391_v26, %v1390_v27 }
 0x3b4   : > { %v1324_v30 = vpop.permute.xlu1 %1323  ;;  %v1414_v45 = vpop.permute.xlu0 %1413 }
 0x3b5   : > { %v1393_v31 = vrot.slane %v1392_v29, 4  ;;  %v1331_v32 = vmul.f32 %v1324_v30, %v1317_v20  ;;  %v1417_v53 = vmul.f32 %v1414_v45, %v1318_v21 }
 0x3b7   : > { %v1394_v39 = vadd.f32 %v1393_v31, %v1392_v29  ;;  %v1333_v40 = vsel %vm883_vm4, %v1331_v32, 0.0  ;;  %v1419_v0 = vsel %vm1334_vm9, %v1417_v53, 0.0 }
 0x3b8   : > { %v1336_v42 = vadd.f32 %v1335_v34, %v1333_v40  ;;  %v1319_v34 = vlaneseq }
 0x3b9   : > { %v1354_v43 = vpop.permute.xlu1 %1353  ;;  %v1395_v44 = vrot.slane %v1394_v39, 2 }
 0x3ba   : > { %v1337_v46 = vrot.slane %v1336_v42, 4  ;;  %v1360_v48 = vmul.f32 %v1354_v43, %v1317_v20 }
 0x3bb   : > { %v1396_v52 = vadd.f32 %v1395_v44, %v1394_v39  ;;  %v1320_v39 = vand.u32 127, %v1319_v34 }
 0x3bc   : > { %v1338_v50 = vadd.f32 %v1337_v46, %v1336_v42  ;;  %v1362_v51 = vsel %vm883_vm4, %v1360_v48, 0.0 }
 0x3bd   : > { %v1364_v54 = vadd.f32 %v1363_v49, %v1362_v51  ;;  %v1397_v63 = vrot.slane %v1396_v52, 1  ;;  %vm1348_vm12 = vcmp.eq.s32.totalorder %v1320_v39, 0  ;;  %vm1375_vm13 = vcmp.eq.s32.totalorder %v1320_v39, 1 }
 0x3be   : > { %v1410_v55 = vpop.permute.xlu1 %1409  ;;  %v1339_v56 = vrot.slane %v1338_v50, 2  ;;  %vm1403_vm14 = vcmp.eq.s32.totalorder %v1320_v39, 2  ;;  %vm1431_vm15 = vcmp.eq.s32.totalorder %v1320_v39, 3 }
 0x3bf   : > { %v1365_v57 = vrot.slane %v1364_v54, 4  ;;  %v1416_v58 = vmul.f32 %v1410_v55, %v1317_v20  ;;  %v1398_v8 = vadd.f32 %v1397_v63, %v1396_v52 }
 0x3c0   : > { %v1340_v61 = vadd.f32 %v1339_v56, %v1338_v50 }
 0x3c1   : > { %v1366_v1 = vadd.f32 %v1365_v57, %v1364_v54  ;;  %v1418_v2 = vsel %vm883_vm4, %v1416_v58, 0.0  ;;  %v1399_v15 = vsel %vm1343_vm10, %v1398_v8, -1e+30  ;;  %v1607_v54 = vld [vmem:[%s3904_s6] sm:$0xf] }
 0x3c2   : > { %v1420_v3 = vadd.f32 %v1419_v0, %v1418_v2  ;;  %v1341_v4 = vrot.slane %v1340_v61, 1  ;;  %v1400_v20 = vsel %vm883_vm4, %v1399_v15, -inf  ;;  %v1306_v22 = vpop.permute.xlu1 %1305  ;;  %v3187_v15 = vld [vmem:[%s3554_s28 + $0x8] sm:$0xff]  }
 0x3c3   : > { %v1367_v5 = vrot.slane %v1366_v1, 2  ;;  %v1308_v29 = vadd.f32 %v1306_v22, %v3633_v47  ;;  %v2856_v22 = vld [vmem:[%s3549_s20] ss:$0 sm:$0xff] }
 0x3c4   : > { %v1421_v6 = vrot.slane %v1420_v3, 4  ;;  %v1342_v7 = vadd.f32 %v1341_v4, %v1340_v61 }
 0x3c5   : > { %v1368_v9 = vadd.f32 %v1367_v5, %v1366_v1 }
 0x3c6   : > { %v1422_v10 = vadd.f32 %v1421_v6, %v1420_v3  ;;  %v1344_v11 = vsel %vm1343_vm10, %v1342_v7, -1e+30  ;;  %v1311_v28 = vpop.permute.xlu1 %1310 }
 0x3c7   : > { %v1345_v12 = vsel %vm883_vm4, %v1344_v11, -inf  ;;  %v1369_v14 = vrot.slane %v1368_v9, 1  ;;  %v1313_v30 = vadd.f32 %v1311_v28, %v1308_v29 }
 0x3c8   : > { %1346 = vmax.xlane.f32.xlu0 %v1345_v12  ;;  %v1423_v17 = vrot.slane %v1422_v10, 2 }
 0x3c9   : > { %v1370_v18 = vadd.f32 %v1369_v14, %v1368_v9  ;;  %v1315_v31 = vmul.f32 0.2, %v1313_v30  ;;  %vm1314_vm11 = vcmp.gt.f32.partialorder %v1313_v30, 0.0 }
 0x3ca   : > { %v1424_v19 = vadd.f32 %v1423_v17, %v1422_v10  ;;  %v3188_v17 = vld [vmem:[%s3554_s28] sm:$0xff]  }
 0x3cb   : > { %v1371_v21 = vsel %vm1343_vm10, %v1370_v18, -1e+30  ;;  %v1316_v32 = vsel %vm1314_vm11, %v1313_v30, %v1315_v31 }
 0x3cc   : > { %1401 = vmax.xlane.f32.xlu0 %v1400_v20  ;;  %v1372_v23 = vsel %vm883_vm4, %v1371_v21, -inf  ;;  %v1425_v24 = vrot.slane %v1424_v19, 1 }
 0x3cd   : > { %1373 = vmax.xlane.f32.xlu1 %v1372_v23 }
 0x3ce   : > { %v1426_v25 = vadd.f32 %v1425_v24, %v1424_v19 }
 0x3d0   : > { %v1427_v26 = vsel %vm1343_vm10, %v1426_v25, -1e+30 }
 0x3d1   : > { %v1428_v27 = vsel %vm883_vm4, %v1427_v26, -inf }
 0x3d2   : > { %1429 = vmax.xlane.f32.xlu0 %v1428_v27 }
 0x3de   : > { %1437 = vrot.lane.b32.xlu1 %v1316_v32, %s3360_s24 }
 0x451   : > { %v1347_v40 = vpop.xlane.xlu0 %1346 }
 0x452   : > { %v1351_v43 = vsel %vm1348_vm12, %v1347_v40, 0.0 }
 0x455   : > { %v1402_v41 = vpop.xlane.xlu0 %1401 }
 0x456   : > { %v1374_v42 = vpop.xlane.xlu1 %1373  ;;  %v1406_v46 = vsel %vm1403_vm14, %v1402_v41, 0.0 }
 0x457   : > { %v1378_v44 = vsel %vm1375_vm13, %v1374_v42, 0.0  ;;  %v2061_v42 = vld [vmem:[#allocation4 + $0x8] sm:$0xf] }
 0x458   : > { %v1379_v45 = vadd.f32 %v1378_v44, %v1351_v43  ;;  %v3189_v43 = vld [vmem:[%s3532_s29 + $0x8] sm:$0xff]  }
 0x45a   : > { %v1407_v48 = vadd.f32 %v1406_v46, %v1379_v45  ;;  %v1438_v52 = vpop.permute.xlu1 %1437  ;;  %v3190_v46 = vld [vmem:[%s3532_s29] sm:$0xff]  }
 0x45b   : > { %v1430_v49 = vpop.xlane.xlu0 %1429 }
 0x45c   : > { %v1434_v50 = vsel %vm1431_vm15, %v1430_v49, 0.0  ;;  %v3192_v49 = vld [vmem:[%s3538_s30 + $0x30] sm:$0xff]  }
 0x45d   : > { %v1435_v51 = vadd.f32 %v1434_v50, %v1407_v48  ;;  %v3191_v48 = vld [vmem:[%s3538_s30 + $0x38] sm:$0xff]   ;;  %v3193_v50 = vld [vmem:[%s3538_s30 + $0x28] sm:$0xff]  }
 0x45f   : > { %v1440_v53 = vmax.f32 %v1435_v51, %v1438_v52  ;;  %v3194_v52 = vld [vmem:[%s3538_s30 + $0x20] sm:$0xff]  }
 0x461   : > { %1523 = vrot.lane.b32.xlu0 %v1440_v53, %s3365_s16  ;;  %3011 = vmatprep.subr.mxu0 %v1440_v53 }
 0x462   : > { %3012 = vmatpush3.msra.mxu0 %v1440_v53 }
 0x463   : > { %3014 = vmatmul.mubr.msk.f32.vlgmr.msra.gmra.mxu0 %vm1131_vm6, %v3640_v59  ;;  %3023 = vmatprep.subr.mxu0 %v3633_v47 }
 0x464   : > { %3024 = vmatpush3.msra.mxu0 %v3633_v47  ;;  %3025 = vmatprep.mubr.msk.f32.mxu0 %vm1131_vm6, %v3642_v60 }
 0x465   : > { %3033 = vmatprep.subr.mxu0 %v3356_v33 }
 0x467   : > { %3026 = vmatmul.mubr.msk.f32.vlgmr.msra.gmra.mxu0 %vm1131_vm6, %v3648_v62 }
 0x468   : > { %3035 = vmatprep.mubr.msk.f32.mxu0 %vm3357_vm1, %v3356_v33  ;;  %3034 = vmatpush3.msk.msra.mxu0 %vm887_vm3, %v1607_v54 }
 0x469   : > { %3045 = vmatprep.subr.mxu0 %v3356_v33 }
 0x4d3   : > { %v1524_v59 = vpop.permute.xlu0 %1523 }
 0x4d4   : > { %v1526_v55 = vsub.f32 %v1316_v32, %v1524_v59  ;;  %v3195_v59 = vld [vmem:[%s3538_s30 + $0x18] sm:$0xff]  }
 0x4d6   : > { %v1527_v56 = vmul.f32 1.442695, %v1526_v55  ;;  %v3196_v55 = vld [vmem:[%s3538_s30 + $0x10] sm:$0xff]  }
 0x4d8   : > { %3204 = vpow2.f32 %v1527_v56 }
 0x4e5   : > { %v3205_v60 = vpop.eup %3204 }
 0x4e6   : > { %1530 = vrot.lane.b32.xlu1 %v3205_v60, %s3360_s24  ;;  %v2863_v60 = vld [vmem:[%s3549_s20 + $0x1] ss:$0 sm:$0xff] }
 0x523   : > { %v3015_v57 = vpop.f32.mrf.mxu0 }
 0x524   : > { %v1517_v62 = vsub.f32 %v3655_v13, %v3015_v57 }
 0x525   : > { %v1507_v58 = vpop.f32.mrf.mxu0 }
 0x526   : > { %v1520_v61 = vmul.f32 1.442695, %v1517_v62  ;;  %v1516_v63 = vsub.f32 %v3659_v16, %v1507_v58  ;;  %v2864_v62 = vld [vmem:[%s3549_s20 + $0x2] ss:$0 sm:$0xff] }
 0x527   : > { %v3027_v3 = vpop.f32.mrf.mxu0 }
 0x528   : > { %3206 = vpow2.f32 %v1520_v61  ;;  %v1518_v0 = vmul.f32 1.442695, %v1516_v63 }
 0x529   : > { %v1674_v7 = vpop.f32.mrf.mxu0 }
 0x52a   : > { %3208 = vpow2.f32 %v1518_v0  ;;  %v3197_v0 = vld [vmem:[%s3538_s30 + $0x8] sm:$0xff]  }
 0x535   : > { %v3207_v1 = vpop.eup %3206 }
 0x536   : > { %3017 = vmatpush3.msk.msra.mxu1 %vm887_vm3, %v3207_v1 }
 0x537   : > { %v3209_v2 = vpop.eup %3208  ;;  %3018 = vmatprep.subr.mxu1 %v3356_v33 }
 0x538   : > { %3019 = vmatpush3.msra.mxu1 %v3209_v2 }
 0x539   : > { %3021 = vmatmul.mubr.msk.f32.vlgmr.msra.gmra.mxu1 %vm883_vm4, %v3605_v38  ;;  %3028 = vmatprep.subr.msk.mxu1 %vm887_vm3, %v1607_v54 }
 0x53a   : > { %3030 = vmatprep.mubr.msk.f32.mxu1 %vm1683_vm0, %v3209_v2  ;;  %3029 = vmatpush3.msk.msra.mxu1 %vm887_vm3, %v1607_v54 }
 0x53b   : > { %3038 = vmatprep.subr.mxu1 %v3356_v33 }
 0x53d   : > { %3031 = vmatmul.mubr.msk.f32.vlgmr.msra.gmra.mxu1 %vm1683_vm0, %v3207_v1  ;;  %v3198_v1 = vld [vmem:[%s3538_s30] sm:$0xff]  }
 0x53e   : > { %3042 = vmatprep.mubr.msk.f32.mxu1 %vm3357_vm1, %v3356_v33 }
 0x558   : > { %v1531_v13 = vpop.permute.xlu1 %1530 }
 0x559   : > { %3036 = vmatmul.mubr.msk.f32.vlgmr.msra.gmra.mxu0 %vm1683_vm0, %v1531_v13 }
 0x55a   : > { %3046 = vmatpush3.msk.msra.mxu0 %vm887_vm3, %v1607_v54  ;;  %3047 = vmatprep.mubr.msk.f32.mxu0 %vm3357_vm1, %v3356_v33 }
 0x5f9   : > { %v1602_v16 = vpop.f32.mrf.mxu1 }
 0x5fa   : > { %v1603_v4 = vadd.f32 %v1602_v16, %v1531_v13 }
 0x5fb   : > { %v3022_v5 = vpop.f32.mrf.mxu1 }
 0x5fc   : > { %3210 = vrcp.f32 %v1603_v4 }
 0x5fd   : > { %v3032_v6 = vpop.f32.mrf.mxu1 }
 0x5fe   : > { %v1768_v8 = vmul.f32 %v3032_v6, %v3027_v3 }
 0x5ff   : > { %v1758_v9 = vpop.f32.mrf.mxu1 }
 0x600   : > { %v1767_v10 = vmul.f32 %v1758_v9, %v1674_v7  ;;  %3039 = vmatpush3.msk.msra.mxu1 %vm887_vm3, %v1768_v8  ;;  %vm2384_vm3 = vcmask 125952   ;;  %v2865_v8 = vld [vmem:[%s720_s5] ss:$0 sm:$0xff] }
 0x601   : > { %3040 = vmatprep.subr.mxu1 %v3356_v33 }
 0x602   : > { %3041 = vmatpush3.msra.mxu1 %v1767_v10 }
 0x603   : > { %3043 = vmatmul.mubr.msk.f32.vlgmr.msra.gmra.mxu1 %vm883_vm4, %v3605_v38  ;;  %3050 = vmatprep.subr.bf16.mxu1 %v3356_v33 }
 0x604   : > { %3054 = vmatprep.mubr.msk.bf16.mxu1 %vm3357_vm1, %v3356_v33  ;;  %3051 = vmatpush3.bf16.msra.mxu1 %v3187_v15 }
 0x605   : > { %3052 = vmatprep.subr.bf16.mxu1 %v3356_v33 }
 0x608   : > { %3053 = vmatpush3.bf16.msra.mxu1 %v3188_v17 }
 0x609   : > { %v3211_v11 = vpop.eup %3210  ;;  %3071 = vmatprep.subr.bf16.mxu1 %v3356_v33 }
 0x60a   : > { %3048 = vmatmul.mubr.msk.f32.vlgmr.msra.gmra.mxu0 %vm1683_vm0, %v3211_v11 }
 0x619   : > { %v1837_v12 = vpop.f32.mrf.mxu0 }
 0x61a   : > { %v1841_v19 = vmul.f32 %v1837_v12, %v3633_v47  ;;  %v2060_v47 = vld [vmem:[#allocation4] sm:$0xff] }
 0x61b   : > { %v3037_v14 = vpop.f32.mrf.mxu0  ;;  %3060 = vmatprep.mubr.msk.f32.mxu0 %vm1131_vm6, %v2060_v47 }
 0x6c3   : > { %v1911_v38 = vpop.f32.mrf.mxu1 }
 0x6c4   : > { %v1912_v20 = vadd.f32 %v1911_v38, %v1841_v19 }
 0x6c5   : > { %v3044_v18 = vpop.f32.mrf.mxu1 }
 0x6ca   : > { %v1984_v21 = vpop.f32.mrf.mxu0 }
 0x6cb   : > { %v1988_v23 = vmul.f32 %v1984_v21, %v1912_v20 }
 0x6cc   : > { %v3049_v24 = vpop.f32.mrf.mxu0 }
 0x6cd   : > { %v1994_v25 = vadd.f32 %v2856_v22, %v1988_v23 }
 0x6cf   : > { %v1999_v26 = vpack.c.bf16 %v1994_v25, %v1994_v25  ;;  %v2145_v27 = vadd.f32 %v1994_v25, %v3596_v35  ;;  %v2857_v35 = vld [vmem:[%s3560_s17] ss:$0 sm:$0xff] }
 0x6d0   : > { %v3199_v25 = vld [vmem:[%s3905_s21] sm:$0xff]  }
 0x6d1   : > { %3055 = vmatmul.mubr.msk.bf16.vlgmr.msra.gmra.mxu1 %vm985_vm2, %v1999_v26  ;;  %v2148_v28 = vsel %vm985_vm2, %v2145_v27, 0.0 }
 0x6d2   : > { %2149 = vadd.xlane.f32.xlu1 %v2148_v28  ;;  %3087 = vmatprep.mubr.msk.bf16.mxu1 %vm3357_vm1, %v3356_v33 }
 0x6d3   : > { %3072 = vmatpush3.bf16.msra.mxu1 %v3191_v48 }
 0x6d4   : > { %3073 = vmatprep.subr.bf16.mxu1 %v3356_v33 }
 0x6d7   : > { %3074 = vmatpush3.bf16.msra.mxu1 %v3192_v49 }
 0x6d8   : > { %3075 = vmatprep.subr.bf16.mxu1 %v3356_v33 }
 0x6db   : > { %3076 = vmatpush3.bf16.msra.mxu1 %v3193_v50 }
 0x6dc   : > { %3077 = vmatprep.subr.bf16.mxu1 %v3356_v33 }
 0x6df   : > { %3078 = vmatpush3.bf16.msra.mxu1 %v3194_v52 }
 0x6e0   : > { %3079 = vmatprep.subr.bf16.mxu1 %v3356_v33 }
 0x6e3   : > { %3080 = vmatpush3.bf16.msra.mxu1 %v3195_v59  ;;  %v3200_v59 = vld [vmem:[%s3554_s28 + $0x28] sm:$0xff]  }
 0x6e4   : > { %3081 = vmatprep.subr.bf16.mxu1 %v3356_v33 }
 0x6e7   : > { %3082 = vmatpush3.bf16.msra.mxu1 %v3196_v55  ;;  %v3201_v55 = vld [vmem:[%s3554_s28 + $0x20] sm:$0xff]  }
 0x6e8   : > { %3083 = vmatprep.subr.bf16.mxu1 %v3356_v33 }
 0x6eb   : > { %3084 = vmatpush3.bf16.msra.mxu1 %v3197_v0 }
 0x6ec   : > { %3085 = vmatprep.subr.bf16.mxu1 %v3356_v33 }
 0x6ef   : > { %3086 = vmatpush3.bf16.msra.mxu1 %v3198_v1 }
 0x75b   : > { %v2150_v29 = vpop.xlane.xlu1 %2149 }
 0x75c   : > { %v2152_v30 = vmul.f32 0.03125, %v2150_v29 }
 0x75e   : > { %v2153_v31 = vsub.f32 %v2145_v27, %v2152_v30 }
 0x760   : > { %v2154_v32 = vmul.f32 %v2153_v31, %v2153_v31 }
 0x762   : > { %v2155_v34 = vsel %vm985_vm2, %v2154_v32, 0.0 }
 0x763   : > { %2156 = vadd.xlane.f32.xlu1 %v2155_v34  ;;  %v2869_v34 = vld [vmem:[%s3549_s20 + $0x3] ss:$0 sm:$0xff] }
 0x791   : > { %v2054_v39 = vpop.f32.mrf.mxu1 }
 0x792   : > { %v2055_v40 = vadd.f32 %v2857_v35, %v2054_v39  ;;  %v2880_v35 = vld [vmem:[%s3560_s17 + $0x1] ss:$0 sm:$0xff] }
 0x793   : > { %v3056_v41 = vpop.f32.mrf.mxu1 }
 0x794   : > { %3058 = vmatprep.subr.mxu0 %v2055_v40 }
 0x795   : > { %v2057_v44 = vpop.f32.mrf.mxu1  ;;  %3059 = vmatpush3.msra.mxu0 %v2055_v40 }
 0x796   : > { %3061 = vmatmul.mubr.msk.f32.vlgmr.msra.gmra.mxu0 %vm1131_vm6, %v2061_v42  ;;  %3063 = vmatprep.subr.bf16.mxu0 %v3356_v33 }
 0x797   : > { %v3057_v45 = vpop.f32.mrf.mxu1  ;;  %3064 = vmatpush3.bf16.msra.mxu0 %v3189_v43  ;;  %3067 = vmatprep.mubr.msk.bf16.mxu0 %vm3357_vm1, %v3356_v33 }
 0x798   : > { %3065 = vmatprep.subr.bf16.mxu0 %v3356_v33  ;;  %v2881_v45 = vld [vmem:[%s3560_s17 + $0x2] ss:$0 sm:$0xff] }
 0x79b   : > { %3066 = vmatpush3.bf16.msra.mxu0 %v3190_v46 }
 0x79c   : > { %3091 = vmatprep.subr.bf16.mxu0 %v3356_v33 }
 0x7ec   : > { %v2157_v51 = vpop.xlane.xlu1 %2156 }
 0x7ed   : > { %v2158_v53 = vmul.f32 0.03125, %v2157_v51 }
 0x7ef   : > { %v2159_v54 = vadd.f32 1e-05, %v2158_v53 }
 0x7f1   : > { %3212 = vrsqrt.f32 %v2159_v54 }
 0x7fe   : > { %v3213_v56 = vpop.eup %3212 }
 0x7ff   : > { %v2161_v57 = vmul.f32 %v3213_v56, %v2153_v31  ;;  %v3202_v56 = vld [vmem:[%s3554_s28 + $0x18] sm:$0xff]  }
 0x801   : > { %v2166_v58 = vmul.f32 %v2863_v60, %v2161_v57  ;;  %v3203_v60 = vld [vmem:[%s3554_s28 + $0x10] sm:$0xff]   ;;  %v2882_v57 = vld [vmem:[%s723_s2] ss:$0 sm:$0xff]  ;;  %s2617_s28 = sshll.u32 %s3366_s27, 4  ;;  %s2618_s28 = int_to_ptr.vmem [resolvable:$true] %s2617_s28 }
 0x802   : > { %s3276_s2 = scalar_lea.vmem %s2618_s28, 128  ;;  %p3283_p5 = scmp.lt.s32.totalorder %s2618_s28, %s2618_s28 }
 0x803   : > { %v3772_v61 = vadd.f32 %v2864_v62, %v2166_v58  ;;  %p3277_p13 = scmp.ne.s32.totalorder %s2618_s28, %s3276_s2  ;;  %p3284_p8 = scmp.lt.s32.totalorder %s3276_s2, %s3276_s2 }
 0x805   : > { %v2176_v63 = vpack.c.bf16 %v3772_v61, %v3772_v61  ;;  %p3278_p0 = pnand %p3277_p13, %p3137_p12  ;;  %p3285_p9 = por %p3284_p8, %p3283_p5 }
 0x807   : > { %3068 = vmatmul.mubr.msk.bf16.vlgmr.msra.gmra.mxu0 %vm985_vm2, %v2176_v63  ;;  %p3279_p1 = pneg %p3278_p0 }
 0x808   : > { %3093 = vmatprep.mubr.msk.bf16.mxu0 %vm3357_vm1, %v3356_v33  ;;  %3092 = vmatpush3.bf16.msra.mxu0 %v3199_v25 }
 0x809   : > { %3097 = vmatprep.subr.bf16.mxu0 %v3356_v33  ;;  %p3286_p10 = pnand %p3285_p9, %p3279_p1 }
 0x856   : > { %v3062_v2 = vpop.f32.mrf.mxu0 }
 0x857   : > { %v2144_v16 = vadd.f32 %v3062_v2, %v3598_v36 }
 0x858   : > { %v2134_v13 = vpop.f32.mrf.mxu0 }
 0x859   : > { %v2143_v3 = vadd.f32 %v2134_v13, %v3600_v37  ;;  %v2378_v5 = vadd.f32 %v3062_v2, %v2144_v16 }
 0x85b   : > { %v2377_v4 = vadd.f32 %v2143_v3, %v2134_v13  ;;  %v2385_v7 = vsel %vm2384_vm3, %v2378_v5, 0.0 }
 0x85d   : > { %v2381_v6 = vsel %vm1038_vm5, %v2377_v4, 0.0 }
 0x85e   : > { %2382 = vadd.xlane.f32.xlu0 %v2381_v6 }
 0x862   : > { %2386 = vadd.xlane.f32.xlu0 %v2385_v7 }
 0x8c7   : > { %v2233_v9 = vpop.f32.mrf.mxu0 }
 0x8c8   : > { %v2234_v10 = vadd.f32 %v2865_v8, %v2233_v9 }
 0x8c9   : > { %v3069_v11 = vpop.f32.mrf.mxu0 }
 0x8ca   : > { %v2239_v36 = vmax.f32 %v2234_v10, 0.0 }
 0x8cb   : > { %v2236_v12 = vpop.f32.mrf.mxu0 }
 0x8cc   : > { %v2256_v37 = vpack.c.bf16 %v2239_v36, %v2239_v36 }
 0x8cd   : > { %v3070_v14 = vpop.f32.mrf.mxu0 }
 0x8ce   : > { %3088 = vmatmul.mubr.bf16.vlgmr.msra.gmra.mxu1 %v2256_v37 }
 0x8e7   : > { %v2383_v15 = vpop.xlane.xlu0 %2382 }
 0x8e8   : > { %v2389_v17 = vmul.f32 0.0625, %v2383_v15 }
 0x8ea   : > { %v2391_v38 = vsub.f32 %v2377_v4, %v2389_v17  ;;  %v2885_v4 = vld [vmem:[%s3560_s17 + $0x3] ss:$0 sm:$0xff] }
 0x8eb   : > { %v2387_v18 = vpop.xlane.xlu0 %2386 }
 0x8ec   : > { %v2390_v19 = vmul.f32 0.0625, %v2387_v18  ;;  %v2393_v20 = vmul.f32 %v2391_v38, %v2391_v38 }
 0x8ee   : > { %v2392_v21 = vsub.f32 %v2378_v5, %v2390_v19  ;;  %v2395_v22 = vsel %vm1038_vm5, %v2393_v20, 0.0 }
 0x8ef   : > { %2396 = vadd.xlane.f32.xlu0 %v2395_v22 }
 0x8f0   : > { %v2394_v23 = vmul.f32 %v2392_v21, %v2392_v21 }
 0x8f2   : > { %v2398_v24 = vsel %vm2384_vm3, %v2394_v23, 0.0 }
 0x8f3   : > { %2399 = vadd.xlane.f32.xlu1 %v2398_v24 }
 0x978   : > { %v2397_v26 = vpop.xlane.xlu0 %2396 }
 0x979   : > { %v2401_v27 = vmul.f32 0.0625, %v2397_v26 }
 0x97b   : > { %v2403_v28 = vadd.f32 1e-05, %v2401_v27 }
 0x97c   : > { %v2400_v47 = vpop.xlane.xlu1 %2399 }
 0x97d   : > { %3214 = vrsqrt.f32 %v2403_v28  ;;  %v2402_v29 = vmul.f32 0.0625, %v2400_v47 }
 0x97f   : > { %v2404_v30 = vadd.f32 1e-05, %v2402_v29 }
 0x981   : > { %3216 = vrsqrt.f32 %v2404_v30  ;;  %v2878_v30 = vld [vmem:[%s3549_s20 + $0x4] ss:$0 sm:$0xff] }
 0x98a   : > { %v3215_v31 = vpop.eup %3214 }
 0x98b   : > { %v2407_v32 = vmul.f32 %v3215_v31, %v2391_v38 }
 0x98d   : > { %v2413_v43 = vmul.f32 %v2880_v35, %v2407_v32  ;;  %v2879_v32 = vld [vmem:[%s3549_s20 + $0x5] ss:$0 sm:$0xff] }
 0x98e   : > { %v3217_v39 = vpop.eup %3216  ;;  %v2344_v40 = vpop.f32.mrf.mxu1 }
 0x98f   : > { %v2408_v41 = vmul.f32 %v3217_v39, %v2392_v21  ;;  %v2345_v42 = vadd.f32 %v2869_v34, %v2344_v40  ;;  %v2419_v51 = vadd.f32 %v2881_v45, %v2413_v43 }
 0x990   : > { %v3089_v44 = vpop.f32.mrf.mxu1 }
 0x991   : > { %v2350_v46 = vadd.f32 %v2345_v42, %v3772_v61  ;;  %v2414_v48 = vmul.f32 %v2880_v35, %v2408_v41 }
 0x992   : > { %v2347_v49 = vpop.f32.mrf.mxu1 }
 0x993   : > { %v2353_v50 = vsel %vm985_vm2, %v2350_v46, 0.0  ;;  %v2420_v52 = vadd.f32 %v2881_v45, %v2414_v48 }
 0x994   : > { %2354 = vadd.xlane.f32.xlu0 %v2353_v50  ;;  %v3090_v53 = vpop.f32.mrf.mxu1 }
 0x995   : > { %v2423_v54 = vpack.c.bf16 %v2420_v52, %v2419_v51 }
 0x997   : > { %3094 = vmatmul.mubr.msk.bf16.vlgmr.msra.gmra.mxu0 %vm1038_vm5, %v2423_v54 }
 0x998   : > { %3105 = vmatprep.mubr.msk.bf16.mxu0 %vm3357_vm1, %v3356_v33  ;;  %3098 = vmatpush3.bf16.msra.mxu0 %v3200_v59  ;;  %vm2521_vm1 = vcmask 523264  }
 0x999   : > { %3099 = vmatprep.subr.bf16.mxu0 %v3356_v33 }
 0x99c   : > { %3100 = vmatpush3.bf16.msra.mxu0 %v3201_v55 }
 0x99d   : > { %3101 = vmatprep.subr.bf16.mxu0 %v3356_v33 }
 0x9a0   : > { %3102 = vmatpush3.bf16.msra.mxu0 %v3202_v56 }
 0x9a1   : > { %3103 = vmatprep.subr.bf16.mxu0 %v3356_v33 }
 0x9a4   : > { %3104 = vmatpush3.bf16.msra.mxu0 %v3203_v60 }
 0xa1d   : > { %v2355_v33 = vpop.xlane.xlu0 %2354 }
 0xa1e   : > { %v2356_v3 = vmul.f32 0.03125, %v2355_v33 }
 0xa20   : > { %v2357_v6 = vsub.f32 %v2350_v46, %v2356_v3 }
 0xa22   : > { %v2358_v12 = vmul.f32 %v2357_v6, %v2357_v6 }
 0xa24   : > { %v2359_v17 = vsel %vm985_vm2, %v2358_v12, 0.0 }
 0xa57   : > { %v2474_v62 = vpop.f32.mrf.mxu0 }
 0xa58   : > { %v2475_v61 = vadd.f32 %v2882_v57, %v2474_v62 }
 0xa59   : > { %v3095_v58 = vpop.f32.mrf.mxu0 }
 0xa5a   : > { %v2481_v2 = vmax.f32 %v2475_v61, 0.0 }
 0xa5b   : > { %v2477_v63 = vpop.f32.mrf.mxu0 }
 0xa5c   : > { %v2478_v0 = vadd.f32 %v2882_v57, %v2477_v63 }
 0xa5d   : > { %v3096_v1 = vpop.f32.mrf.mxu0 }
 0xa5e   : > { %v2482_v13 = vmax.f32 %v2478_v0, 0.0 }
 0xa60   : > { %v2491_v16 = vpack.c.bf16 %v2482_v13, %v2481_v2 }
 0xa62   : > { %3106 = vmatmul.mubr.msk.bf16.vlgmr.msra.gmra.mxu0 %vm2521_vm1, %v2491_v16 }
 0xb22   : > { %v2559_v5 = vpop.f32.mrf.mxu0 }
 0xb23   : > { %v2560_v7 = vadd.f32 %v2885_v4, %v2559_v5 }
 0xb24   : > { %v3107_v8 = vpop.f32.mrf.mxu0 }
 0xb25   : > { %v2566_v9 = vadd.f32 %v2560_v7, %v2419_v51 }
 0xb26   : > { %v2562_v10 = vpop.f32.mrf.mxu0 }
 0xb27   : > { %v2563_v11 = vadd.f32 %v2885_v4, %v2562_v10  ;;  %v2570_v36 = vsel %vm1038_vm5, %v2566_v9, 0.0 }
 0xb28   : > { %2571 = vadd.xlane.f32.xlu1 %v2570_v36  ;;  %v3108_v37 = vpop.f32.mrf.mxu0 }
 0xb29   : > { %v2567_v14 = vadd.f32 %v2563_v11, %v2420_v52 }
 0xb2b   : > { %v2573_v15 = vsel %vm2384_vm3, %v2567_v14, 0.0 }
 0xb2c   : > { %2574 = vadd.xlane.f32.xlu0 %v2573_v15  ;;  %2360 = vadd.xlane.f32.xlu1 %v2359_v17 }
 0xbb1   : > { %v2572_v38 = vpop.xlane.xlu1 %2571 }
 0xbb2   : > { %v2576_v18 = vmul.f32 0.0625, %v2572_v38 }
 0xbb4   : > { %v2578_v19 = vsub.f32 %v2566_v9, %v2576_v18 }
 0xbb5   : > { %v2361_v20 = vpop.xlane.xlu1 %2360  ;;  %v2575_v21 = vpop.xlane.xlu0 %2574 }
 0xbb6   : > { %v2362_v22 = vmul.f32 0.03125, %v2361_v20  ;;  %v2577_v23 = vmul.f32 0.0625, %v2575_v21  ;;  %v2580_v24 = vmul.f32 %v2578_v19, %v2578_v19 }
 0xbb8   : > { %v2363_v25 = vadd.f32 1e-05, %v2362_v22  ;;  %v2579_v26 = vsub.f32 %v2567_v14, %v2577_v23  ;;  %v2582_v27 = vsel %vm1038_vm5, %v2580_v24, 0.0 }
 0xbb9   : > { %2583 = vadd.xlane.f32.xlu0 %v2582_v27 }
 0xbba   : > { %3218 = vrsqrt.f32 %v2363_v25  ;;  %v2581_v28 = vmul.f32 %v2579_v26, %v2579_v26 }
 0xbbc   : > { %v2585_v47 = vsel %vm2384_vm3, %v2581_v28, 0.0 }
 0xbbd   : > { %2586 = vadd.xlane.f32.xlu1 %v2585_v47 }
 0xbc7   : > { %v3219_v29 = vpop.eup %3218 }
 0xbc8   : > { %v2365_v31 = vmul.f32 %v3219_v29, %v2357_v6 }
 0xbca   : > { %v2370_v34 = vmul.f32 %v2878_v30, %v2365_v31 }
 0xbcc   : > { %v2375_v35 = vadd.f32 %v2879_v32, %v2370_v34 }
 0xbce   : > { %2376 = vst.msk [vmem:[#allocation13] sm:$0xff] %vm985_vm2, %v2375_v35 }
 0xbcf   : > { %3289 = shalt.err (!%p3286_p10)
}
 0xbd0   : > { %s3906_s18 = sld [smem:[#allocation27_spill]]  ;;  %v2891_v46 = vld [vmem:[%s3560_s17 + $0x4] ss:$0 sm:$0xff]  ;;  %v2892_v49 = vld [vmem:[%s3560_s17 + $0x5] ss:$0 sm:$0xff]  ;;  %s3367_s16 = smov [#allocation14]  }
 0xbd1   : > { %s2627_s1 = sshll.u32 %s3367_s16, 4  ;;  %s2628_s1 = int_to_ptr.vmem [resolvable:$true] %s2627_s1 }
 0xbd2   : > { %s3300_s22 = scalar_lea.vmem %s2628_s1, 256  ;;  %p3307_p3 = scmp.lt.s32.totalorder %s2628_s1, %s2628_s1 }
 0xbd3   : > { %p3301_p11 = scmp.ne.s32.totalorder %s2628_s1, %s3300_s22  ;;  %p3308_p4 = scmp.lt.s32.totalorder %s3300_s22, %s3300_s22 }
 0xbd5   : > { %p3302_p7 = pnand %p3301_p11, %p3137_p12  ;;  %p3309_p6 = por %p3308_p4, %p3307_p3 }
 0xbd6   : > { %3119 = dma.vmem_to_hbm [thread:$0]  (%p3137_p12), %s2618_s28, 128, %s3906_s18, [#allocation10]  }
 0xbd7   : > { %p3303_p2 = pneg %p3302_p7 }
 0xbd9   : > { %p3310_p13 = pnand %p3309_p6, %p3303_p2 }
 0xc42   : > { %v2584_v39 = vpop.xlane.xlu0 %2583 }
 0xc43   : > { %v2588_v40 = vmul.f32 0.0625, %v2584_v39 }
 0xc45   : > { %v2590_v41 = vadd.f32 1e-05, %v2588_v40 }
 0xc46   : > { %v2587_v42 = vpop.xlane.xlu1 %2586 }
 0xc47   : > { %3220 = vrsqrt.f32 %v2590_v41  ;;  %v2589_v43 = vmul.f32 0.0625, %v2587_v42 }
 0xc49   : > { %v2591_v44 = vadd.f32 1e-05, %v2589_v43 }
 0xc4b   : > { %3222 = vrsqrt.f32 %v2591_v44 }
 0xc54   : > { %v3221_v45 = vpop.eup %3220 }
 0xc55   : > { %v2594_v48 = vmul.f32 %v3221_v45, %v2578_v19 }
 0xc57   : > { %v2600_v50 = vmul.f32 %v2891_v46, %v2594_v48 }
 0xc58   : > { %v3223_v51 = vpop.eup %3222 }
 0xc59   : > { %v2595_v52 = vmul.f32 %v3223_v51, %v2579_v26  ;;  %v2606_v53 = vadd.f32 %v2892_v49, %v2600_v50 }
 0xc5b   : > { %v2601_v54 = vmul.f32 %v2891_v46, %v2595_v52  ;;  %2608 = vst.msk [vmem:[#allocation14] sm:$0xff] %vm1038_vm5, %v2606_v53 }
 0xc5d   : > { %v2607_v59 = vadd.f32 %v2892_v49, %v2601_v54 }
 0xc5f   : > { %2609 = vst.msk [vmem:[#allocation14 + $0x8] sm:$0xf] %vm2384_vm3, %v2607_v59 }
 0xc60   : > { %3313 = shalt.err (!%p3310_p13)
}
 0xc61   : > { %s3368_s17 = smov 128   ;;  %s3369_s6 = smov 8  }
 0xc62   : > { %s3907_s30 = sld [smem:[#allocation28_spill]] }
 0xc68   : > { %3121 = dma.vmem_to_hbm [thread:$0]  (%p3137_p12), %s2628_s1, 256, %s3907_s30, [#allocation15], %s3368_s17, %s3368_s17, %s3369_s6  }
 0xc69   : > { %3337 = dma.done.wait (%p3137_p12), [#allocation10], 128  }
 0xc6a   : > { %3339 = vsyncadd (%p3137_p12), [#allocation10], 4294967168 }
 0xc6b   : > { %3341 = dma.done.wait (%p3137_p12), [#allocation15], 256  }
 0xc6c   : > { %3343 = vsyncadd (%p3137_p12), [#allocation15], 4294967040 }
 0xc6d PF: > { %s3908_s5 = sld [smem:[#allocation20_spill]] }
 0xc73   : > { %s32_s24 = sadd.s32 1, %s3908_s5  }
 0xc74   : > { %p29_p0 = scmp.ge.s32.totalorder %s32_s24, 7  }
 0xc76   :  { %31 = sbr.rel (!%p29_p0) target bundleno = 12 (0xc), region = 159 }
 0xc7b   :  { %2647 = vsyncpa [#allocation9], 1 }
 0xc7c   :  { %2649 = vsyncpa [#allocation9 + $0x1], 1 }
 0xc7d   :  { %2650 = vsyncpa [#allocation12], 1 }
 0xc7e   :  { %2651 = vsyncpa [#allocation10], 1 }
 0xc7f   :  { %2653 = vsyncpa [#allocation10 + $0x1], 1 }
 0xc80   :  { %2654 = vsyncpa [#allocation15], 1 }

</bundles_post_ra>
